<compile_context>
chip_gen: v6e
topology: v6e:2x2x1
jax: 0.10.0
libtpu: 0.0.40
codegen_flags: <defaults>
</compile_context>

<pallas_src>
import functools
from math import sqrt

import jax
import jax.numpy as jnp
from jax.experimental import pallas as pl
from jax.experimental.pallas import tpu as pltpu

MAX_TILE_M = 2048      # conv row-tile cap (<= ~8 MiB double-buffered slabs at K<=256)
FC_MAX_TILE_M = 1024   # bounds the (tile_m, 1024) f32 hidden on v7x's 64 MiB VMEM


def calculate_conv_layer_output_size(n, p, f, s):
    return int((n + 2 * p - f) / s + 1)


# ----------------------------------------------------------------------------
# small helpers
# ----------------------------------------------------------------------------
def _round_up(x, m):
    return (x + m - 1) // m * m


def _pad2d(a, rows, cols):
    r, c = a.shape
    return jnp.pad(a, ((0, rows - r), (0, cols - c)))


def _pick_row_tiling(m, max_tile=MAX_TILE_M):
    """Pad row count and pick a row tile (multiple of 16 for bf16 sublane packing).
    Guarantees >= 2 grid steps whenever M > 16 so v7x's two TensorCores both get
    work via dimension_semantics=("parallel",); single step only for truly tiny M."""
    m16 = _round_up(m, 16)
    if m16 <= 16:
        return m16, m16
    tile = min(max_tile, _round_up(pl.cdiv(m16, 2), 16))
    m_pad = _round_up(m16, tile)
    return m_pad, tile


def _apply_act(y, act):
    if act == "relu":
        return jnp.maximum(y, 0.0)
    if act == "leaky_relu":
        return jnp.where(y > 0, y, 0.1 * y)   # nn.LeakyReLU(0.1) per the spec
    if act == "tanh":
        return jnp.tanh(y)
    return y


def _fold_bn(lp, eps=1e-5):
    """Fold conv bias + BatchNorm(eval) into per-channel scale/shift (f32)."""
    cout = lp["w"].shape[1]
    s = lp["gamma"] / jnp.sqrt(lp["var"] + eps)
    scale = s.reshape(1, cout).astype(jnp.float32)
    shift = (lp["b"] * s + lp["beta"] - lp["mean"] * s).reshape(1, cout)
    return scale, shift.astype(jnp.float32)


@functools.lru_cache(maxsize=1)
def _vmem_limit_bytes():
    """Per-generation scoped-VMEM cap: ~60% of physical VMEM (v5e/v6e 128 MiB ->
    ~76 MiB, v7x 64 MiB -> ~38 MiB); conservative 32 MiB fallback."""
    try:
        cap = int(pltpu.get_tpu_info().vmem_capacity_bytes)
        return min(int(cap * 0.6), 100 * 1024 * 1024)
    except Exception:
        return 32 * 1024 * 1024


def _compiler_params():
    return pltpu.CompilerParams(
        dimension_semantics=("parallel",),
        vmem_limit_bytes=_vmem_limit_bytes(),
    )


def _im2col(xp, n, ho, wo, c, row_off, col_off, step):
    """Strided-slice im2col on the zero-padded NHWC input: one (n*ho*wo, 16*c)
    slab whose row r is the 4x4xC patch of conv-output pixel r. row/col offsets
    select a 2x2 pool tap (step=4) or the plain conv grid (step=2)."""
    cols = [xp[:, kh + row_off: kh + row_off + step * ho: step,
               kw + col_off: kw + col_off + step * wo: step, :]
            for kh in range(4) for kw in range(4)]
    return jnp.stack(cols, axis=3).reshape(n * ho * wo, 16 * c)


# ----------------------------------------------------------------------------
# Pallas kernels
# ----------------------------------------------------------------------------
def _conv_bn_act_pool_kernel(c_ref, w_ref, scale_ref, shift_ref, o_ref, *, act):
    """One MXU stream over the 4 stacked pool-tap slabs, one BN-affine VPU pass,
    4-way max + activation (monotone => act(max) == max(act)), stored once."""
    t = o_ref.shape[0]
    c = jnp.concatenate([c_ref[0], c_ref[1], c_ref[2], c_ref[3]], axis=0)
    y = jnp.dot(c, w_ref[...], preferred_element_type=jnp.float32)
    y = y * scale_ref[...] + shift_ref[...]
    y = jnp.maximum(jnp.maximum(y[:t], y[t:2 * t]),
                    jnp.maximum(y[2 * t:3 * t], y[3 * t:]))
    o_ref[...] = _apply_act(y, act).astype(o_ref.dtype)


def _conv_bn_act_kernel(c_ref, w_ref, scale_ref, shift_ref, o_ref, *, act):
    y = jnp.dot(c_ref[...], w_ref[...], preferred_element_type=jnp.float32)
    o_ref[...] = _apply_act(y * scale_ref[...] + shift_ref[...], act).astype(o_ref.dtype)


def _conv3_fc_kernel(c_ref, w3_ref, scale_ref, shift_ref,
                     w1_ref, b1_ref, w2_ref, b2_ref, o_ref, *, act):
    """layer_3 conv (im2col) + BN + act, flatten (1x1 spatial), Dropout(eval)
    identity, fc1 + act, fc2 — everything stays in VMEM."""
    y3 = jnp.dot(c_ref[...], w3_ref[...], preferred_element_type=jnp.float32)
    y3 = _apply_act(y3 * scale_ref[...] + shift_ref[...], act)
    h = jnp.dot(y3.astype(w1_ref.dtype), w1_ref[...],
                preferred_element_type=jnp.float32)
    h = _apply_act(h + b1_ref[...], act).astype(w2_ref.dtype)   # bf16 hidden
    y = jnp.dot(h, w2_ref[...], preferred_element_type=jnp.float32)
    o_ref[...] = (y + b2_ref[...]).astype(o_ref.dtype)


def _fc_fused_kernel(x_ref, w1_ref, b1_ref, w2_ref, b2_ref, o_ref, *, act):
    h = jnp.dot(x_ref[...], w1_ref[...], preferred_element_type=jnp.float32)
    h = _apply_act(h + b1_ref[...], act).astype(w2_ref.dtype)   # bf16 hidden
    y = jnp.dot(h, w2_ref[...], preferred_element_type=jnp.float32)
    o_ref[...] = (y + b2_ref[...]).astype(o_ref.dtype)


# ----------------------------------------------------------------------------
# layer wrappers (host glue: im2col strided slices + row padding only)
# ----------------------------------------------------------------------------
def conv_bn_act_pool(x, lp, act):
    """Fused Conv2d(4,2,1) + BN(eval) + act + MaxPool2d(2,2). x: NHWC bf16."""
    n, h, w_in, c = x.shape
    ho = calculate_conv_layer_output_size(h, 1, 4, 2)
    wo = calculate_conv_layer_output_size(w_in, 1, 4, 2)
    hp, wp = ho // 2, wo // 2
    m, k = n * hp * wp, 16 * c                      # K left unpadded (e.g. 48)
    cout = lp["w"].shape[1]
    m_pad, tile_m = _pick_row_tiling(m)

    xp = jnp.pad(x, ((0, 0), (1, 1), (1, 1), (0, 0)))
    taps = jnp.stack(
        [_pad2d(_im2col(xp, n, hp, wp, c, 2 * dh, 2 * dw, 4).astype(jnp.bfloat16),
                m_pad, k)
         for dh in (0, 1) for dw in (0, 1)], axis=0)            # (4, m_pad, k)

    scale, shift = _fold_bn(lp)
    w = lp["w"].astype(jnp.bfloat16)                            # (k, cout), unpadded

    out = pl.pallas_call(
        functools.partial(_conv_bn_act_pool_kernel, act=act),
        out_shape=jax.ShapeDtypeStruct((m_pad, cout), jnp.bfloat16),
        grid=(m_pad // tile_m,),
        in_specs=[
            pl.BlockSpec((4, tile_m, k), lambda i: (0, i, 0)),
            pl.BlockSpec((k, cout), lambda i: (0, 0)),
            pl.BlockSpec((1, cout), lambda i: (0, 0)),
            pl.BlockSpec((1, cout), lambda i: (0, 0)),
        ],
        out_specs=pl.BlockSpec((tile_m, cout), lambda i: (i, 0)),
        compiler_params=_compiler_params(),
        cost_estimate=pl.CostEstimate(
            flops=2 * 4 * m_pad * k * cout,
            transcendentals=4 * m_pad * cout if act == "tanh" else 0,
            bytes_accessed=2 * (4 * m_pad * k + k * cout + m_pad * cout)),
    )(taps, w, scale, shift)
    return out[:m].reshape(n, hp, wp, cout)


def conv_bn_act(x, lp, act):
    """Fused Conv2d(4,2,1) + BN(eval) + act (no pool) — fallback when
    layer_3_output_size > 1. x: NHWC bf16."""
    n, h, w_in, c = x.shape
    ho = calculate_conv_layer_output_size(h, 1, 4, 2)
    wo = calculate_conv_layer_output_size(w_in, 1, 4, 2)
    m, k = n * ho * wo, 16 * c
    cout = lp["w"].shape[1]
    m_pad, tile_m = _pick_row_tiling(m)

    xp = jnp.pad(x, ((0, 0), (1, 1), (1, 1), (0, 0)))
    patch = _pad2d(_im2col(xp, n, ho, wo, c, 0, 0, 2).astype(jnp.bfloat16), m_pad, k)
    scale, shift = _fold_bn(lp)
    w = lp["w"].astype(jnp.bfloat16)

    out = pl.pallas_call(
        functools.partial(_conv_bn_act_kernel, act=act),
        out_shape=jax.ShapeDtypeStruct((m_pad, cout), jnp.bfloat16),
        grid=(m_pad // tile_m,),
        in_specs=[
            pl.BlockSpec((tile_m, k), lambda i: (i, 0)),
            pl.BlockSpec((k, cout), lambda i: (0, 0)),
            pl.BlockSpec((1, cout), lambda i: (0, 0)),
            pl.BlockSpec((1, cout), lambda i: (0, 0)),
        ],
        out_specs=pl.BlockSpec((tile_m, cout), lambda i: (i, 0)),
        compiler_params=_compiler_params(),
        cost_estimate=pl.CostEstimate(
            flops=2 * m_pad * k * cout,
            transcendentals=m_pad * cout if act == "tanh" else 0,
            bytes_accessed=2 * (m_pad * k + k * cout + m_pad * cout)),
    )(patch, w, scale, shift)
    return out[:m].reshape(n, ho, wo, cout)


def conv3_fc_fused(x, lp, params, act):
    """Fused layer_3 (Conv2d(4,2,1)+BN+act with 1x1 spatial output) + flatten +
    Dropout(eval) + fc1 + act + fc2 in one kernel. Valid when
    layer_3_output_size == 1 (then NHWC and NCHW flatten orders coincide)."""
    n, h, w_in, c = x.shape
    k3 = 16 * c
    l3 = lp["w"].shape[1]
    h1 = params["fc1_w"].shape[1]
    ncls = params["fc2_w"].shape[1]
    assert params["fc1_w"].shape[0] == l3
    m_pad, tile_m = _pick_row_tiling(n, FC_MAX_TILE_M)

    xp = jnp.pad(x, ((0, 0), (1, 1), (1, 1), (0, 0)))
    patch = _pad2d(_im2col(xp, n, 1, 1, c, 0, 0, 2).astype(jnp.bfloat16), m_pad, k3)

    scale, shift = _fold_bn(lp)
    w3 = lp["w"].astype(jnp.bfloat16)                       # (k3, l3)
    w1 = params["fc1_w"].astype(jnp.bfloat16)               # (l3, 1024)
    b1 = params["fc1_b"].reshape(1, h1).astype(jnp.float32)
    w2 = params["fc2_w"].astype(jnp.bfloat16)               # (1024, ncls)
    b2 = params["fc2_b"].reshape(1, ncls).astype(jnp.float32)

    out = pl.pallas_call(
        functools.partial(_conv3_fc_kernel, act=act),
        out_shape=jax.ShapeDtypeStruct((m_pad, ncls), jnp.float32),
        grid=(m_pad // tile_m,),
        in_specs=[
            pl.BlockSpec((tile_m, k3), lambda i: (i, 0)),
            pl.BlockSpec((k3, l3), lambda i: (0, 0)),
            pl.BlockSpec((1, l3), lambda i: (0, 0)),
            pl.BlockSpec((1, l3), lambda i: (0, 0)),
            pl.BlockSpec((l3, h1), lambda i: (0, 0)),
            pl.BlockSpec((1, h1), lambda i: (0, 0)),
            pl.BlockSpec((h1, ncls), lambda i: (0, 0)),
            pl.BlockSpec((1, ncls), lambda i: (0, 0)),
        ],
        out_specs=pl.BlockSpec((tile_m, ncls), lambda i: (i, 0)),
        compiler_params=_compiler_params(),
        cost_estimate=pl.CostEstimate(
            flops=2 * m_pad * (k3 * l3 + l3 * h1 + h1 * ncls),
            transcendentals=m_pad * (l3 + h1) if act == "tanh" else 0,
            bytes_accessed=2 * (m_pad * k3 + k3 * l3 + l3 * h1 + h1 * ncls)
                           + 4 * m_pad * ncls),
    )(patch, w3, scale, shift, w1, b1, w2, b2)
    return out[:n]


def fc_fused(x2d, params, act):
    """Dropout(eval)=identity + fc1 + act + fc2 (fallback FC path); the hidden
    activation stays in VMEM."""
    m, k1 = x2d.shape
    h1 = params["fc1_w"].shape[1]
    ncls = params["fc2_w"].shape[1]
    m_pad, tile_m = _pick_row_tiling(m, FC_MAX_TILE_M)

    x_p = _pad2d(x2d.astype(jnp.bfloat16), m_pad, k1)
    w1 = params["fc1_w"].astype(jnp.bfloat16)
    b1 = params["fc1_b"].reshape(1, h1).astype(jnp.float32)
    w2 = params["fc2_w"].astype(jnp.bfloat16)
    b2 = params["fc2_b"].reshape(1, ncls).astype(jnp.float32)

    out = pl.pallas_call(
        functools.partial(_fc_fused_kernel, act=act),
        out_shape=jax.ShapeDtypeStruct((m_pad, ncls), jnp.float32),
        grid=(m_pad // tile_m,),
        in_specs=[
            pl.BlockSpec((tile_m, k1), lambda i: (i, 0)),
            pl.BlockSpec((k1, h1), lambda i: (0, 0)),
            pl.BlockSpec((1, h1), lambda i: (0, 0)),
            pl.BlockSpec((h1, ncls), lambda i: (0, 0)),
            pl.BlockSpec((1, ncls), lambda i: (0, 0)),
        ],
        out_specs=pl.BlockSpec((tile_m, ncls), lambda i: (i, 0)),
        compiler_params=_compiler_params(),
        cost_estimate=pl.CostEstimate(
            flops=2 * m_pad * (k1 * h1 + h1 * ncls),
            transcendentals=m_pad * h1 if act == "tanh" else 0,
            bytes_accessed=2 * (m_pad * k1 + k1 * h1 + h1 * ncls) + 4 * m_pad * ncls),
    )(x_p, w1, b1, w2, b2)
    return out[:m]


# ----------------------------------------------------------------------------
# parameter construction (deterministic, shapes from ArtisanalCNN.__init__)
# ----------------------------------------------------------------------------
def init_params(key, image_size, l1, l2, l3, num_classes):
    side = int(sqrt(image_size / 3))
    s1 = calculate_conv_layer_output_size(side, 1, 4, 2) // 2
    s2 = calculate_conv_layer_output_size(s1, 1, 4, 2) // 2
    s3 = calculate_conv_layer_output_size(s2, 1, 4, 2)
    fc_in = l3 * s3 * s3

    keys = iter(jax.random.split(key, 22))   # 3 conv layers * 6 + 4 fc tensors

    def conv_layer(cin, cout):
        w = jax.random.normal(next(keys), (4 * 4 * cin, cout), jnp.float32)
        w = w * (1.0 / sqrt(16 * cin))
        return {
            "w": w,
            "b": 0.01 * jax.random.normal(next(keys), (cout,), jnp.float32),
            "gamma": 1.0 + 0.1 * jax.random.normal(next(keys), (cout,), jnp.float32),
            "beta": 0.1 * jax.random.normal(next(keys), (cout,), jnp.float32),
            "mean": 0.05 * jax.random.normal(next(keys), (cout,), jnp.float32),
            "var": jnp.abs(0.2 * jax.random.normal(next(keys), (cout,), jnp.float32)) + 0.8,
        }

    return {
        "layer1": conv_layer(3, l1),
        "layer2": conv_layer(l1, l2),
        "layer3": conv_layer(l2, l3),
        "fc1_w": jax.random.normal(next(keys), (fc_in, 1024), jnp.float32) / sqrt(fc_in),
        "fc1_b": 0.01 * jax.random.normal(next(keys), (1024,), jnp.float32),
        "fc2_w": jax.random.normal(next(keys), (1024, num_classes), jnp.float32) / sqrt(1024),
        "fc2_b": 0.01 * jax.random.normal(next(keys), (num_classes,), jnp.float32),
    }


# ----------------------------------------------------------------------------
# full forward pass
# ----------------------------------------------------------------------------
def artisanal_cnn_forward(x_nchw, params, act="relu"):
    # Accept NCHW (PyTorch convention), convert to NHWC bf16 for the kernels.
    x = jnp.transpose(x_nchw, (0, 2, 3, 1)).astype(jnp.bfloat16)

    x = conv_bn_act_pool(x, params["layer1"], act)   # layer_1: conv+BN+act+pool
    x = conv_bn_act_pool(x, params["layer2"], act)   # layer_2: conv+BN+act+pool

    s3 = calculate_conv_layer_output_size(x.shape[1], 1, 4, 2)
    if s3 == 1:
        # layer_3 + flatten + Dropout(eval) + fc1 + act + fc2, fully fused.
        return conv3_fc_fused(x, params["layer3"], params, act)

    # General fallback: separate layer_3 kernel, NCHW-order flatten, FC kernel.
    x = conv_bn_act(x, params["layer3"], act)        # layer_3: conv+BN+act
    n = x.shape[0]
    x = jnp.transpose(x, (0, 3, 1, 2)).reshape(n, -1)   # PyTorch NCHW flatten
    return fc_fused(x, params, act)                  # fc1(+Dropout eval)+act+fc2


if __name__ == "__main__":
    # Small config: 32x32 RGB images -> image_size = 3*32*32 = 3072
    #   layer_1_output_size = 8, layer_2_output_size = 2, layer_3_output_size = 1
    batch = 2
    side = 32
    image_size = 3 * side * side
    l1, l2, l3 = 8, 16, 32
    num_classes = 10

    key = jax.random.PRNGKey(0)
    k_params, k_x = jax.random.split(key)
    params = init_params(k_params, image_size, l1, l2, l3, num_classes)
    x = jax.random.normal(k_x, (batch, 3, side, side), jnp.float32)

    fwd = jax.jit(functools.partial(artisanal_cnn_forward, act="relu"))
    out = jax.block_until_ready(fwd(x, params))

    assert out.shape == (batch, num_classes), out.shape
    assert bool(jnp.all(jnp.isfinite(out)))
    print("KERNEL_OK")
</pallas_src>

<mosaic_0001>
module attributes {stable_mosaic.version = 11 : i64} {
  func.func @_conv_bn_act_pool_kernel(%arg0: i32, %arg1: memref<4x64x48xbf16, #tpu.memory_space<vmem>>, %arg2: memref<48x8xbf16, #tpu.memory_space<vmem>>, %arg3: memref<1x8xf32, #tpu.memory_space<vmem>>, %arg4: memref<1x8xf32, #tpu.memory_space<vmem>>, %arg5: memref<64x8xbf16, #tpu.memory_space<vmem>>) attributes {dimension_semantics = [#tpu.dimension_semantics<parallel>], iteration_bounds = array<i64: 2>, scalar_prefetch = 0 : i64, scratch_operands = 0 : i64, tpu.core_type = #tpu.core_type<tc>, window_params = [{transform_indices = @transform_0, window_bounds = array<i64: 4, 64, 48>}, {pipeline_mode = #tpu.pipeline_mode<synchronous>, transform_indices = @transform_1, window_bounds = array<i64: 48, 8>}, {pipeline_mode = #tpu.pipeline_mode<synchronous>, transform_indices = @transform_2, window_bounds = array<i64: 1, 8>}, {pipeline_mode = #tpu.pipeline_mode<synchronous>, transform_indices = @transform_3, window_bounds = array<i64: 1, 8>}, {transform_indices = @transform_4, window_bounds = array<i64: 64, 8>}]} {
    %c0 = arith.constant 0 : index
    %c0_0 = arith.constant 0 : index
    %c0_1 = arith.constant 0 : index
    %0 = vector.load %arg1[%c0, %c0_0, %c0_1] : memref<4x64x48xbf16, #tpu.memory_space<vmem>>, vector<1x64x48xbf16>
    %1 = vector.shape_cast %0 : vector<1x64x48xbf16> to vector<64x48xbf16>
    %c1 = arith.constant 1 : index
    %c0_2 = arith.constant 0 : index
    %c0_3 = arith.constant 0 : index
    %2 = vector.load %arg1[%c1, %c0_2, %c0_3] : memref<4x64x48xbf16, #tpu.memory_space<vmem>>, vector<1x64x48xbf16>
    %3 = vector.shape_cast %2 : vector<1x64x48xbf16> to vector<64x48xbf16>
    %c2 = arith.constant 2 : index
    %c0_4 = arith.constant 0 : index
    %c0_5 = arith.constant 0 : index
    %4 = vector.load %arg1[%c2, %c0_4, %c0_5] : memref<4x64x48xbf16, #tpu.memory_space<vmem>>, vector<1x64x48xbf16>
    %5 = vector.shape_cast %4 : vector<1x64x48xbf16> to vector<64x48xbf16>
    %c3 = arith.constant 3 : index
    %c0_6 = arith.constant 0 : index
    %c0_7 = arith.constant 0 : index
    %6 = vector.load %arg1[%c3, %c0_6, %c0_7] : memref<4x64x48xbf16, #tpu.memory_space<vmem>>, vector<1x64x48xbf16>
    %7 = vector.shape_cast %6 : vector<1x64x48xbf16> to vector<64x48xbf16>
    %8 = tpu.concatenate %1, %3, %5, %7 in 0 : vector<64x48xbf16>, vector<64x48xbf16>, vector<64x48xbf16>, vector<64x48xbf16> -> vector<256x48xbf16>
    %c0_8 = arith.constant 0 : index
    %c0_9 = arith.constant 0 : index
    %9 = vector.load %arg2[%c0_8, %c0_9] : memref<48x8xbf16, #tpu.memory_space<vmem>>, vector<48x8xbf16>
    %cst = arith.constant dense<0.000000e+00> : vector<256x8xf32>
    %10 = tpu.matmul %8, %9, %cst {dimension_numbers = #tpu.dot_dimension_numbers<[1], [0], [0], [1], [0, 0, 1, 1], [], []>} : vector<256x48xbf16>, vector<48x8xbf16>, vector<256x8xf32> -> vector<256x8xf32>
    %c0_10 = arith.constant 0 : index
    %c0_11 = arith.constant 0 : index
    %11 = vector.load %arg3[%c0_10, %c0_11] : memref<1x8xf32, #tpu.memory_space<vmem>>, vector<1x8xf32>
    %12 = vector.broadcast %11 : vector<1x8xf32> to vector<256x8xf32>
    %13 = arith.mulf %10, %12 : vector<256x8xf32>
    %c0_12 = arith.constant 0 : index
    %c0_13 = arith.constant 0 : index
    %14 = vector.load %arg4[%c0_12, %c0_13] : memref<1x8xf32, #tpu.memory_space<vmem>>, vector<1x8xf32>
    %15 = vector.broadcast %14 : vector<1x8xf32> to vector<256x8xf32>
    %16 = arith.addf %13, %15 : vector<256x8xf32>
    %17 = vector.extract_strided_slice %16 {offsets = [0, 0], sizes = [64, 8], strides = [1, 1]} : vector<256x8xf32> to vector<64x8xf32>
    %18 = vector.extract_strided_slice %16 {offsets = [64, 0], sizes = [64, 8], strides = [1, 1]} : vector<256x8xf32> to vector<64x8xf32>
    %19 = arith.maximumf %17, %18 : vector<64x8xf32>
    %20 = vector.extract_strided_slice %16 {offsets = [128, 0], sizes = [64, 8], strides = [1, 1]} : vector<256x8xf32> to vector<64x8xf32>
    %21 = vector.extract_strided_slice %16 {offsets = [192, 0], sizes = [64, 8], strides = [1, 1]} : vector<256x8xf32> to vector<64x8xf32>
    %22 = arith.maximumf %20, %21 : vector<64x8xf32>
    %23 = arith.maximumf %19, %22 : vector<64x8xf32>
    %cst_14 = arith.constant 0.000000e+00 : f32
    %24 = vector.broadcast %cst_14 : f32 to vector<64x8xf32>
    %25 = arith.maximumf %23, %24 : vector<64x8xf32>
    %26 = arith.truncf %25 : vector<64x8xf32> to vector<64x8xbf16>
    %c0_15 = arith.constant 0 : index
    %c0_16 = arith.constant 0 : index
    %27 = vector.load %arg5[%c0_15, %c0_16] : memref<64x8xbf16, #tpu.memory_space<vmem>>, vector<64x8xbf16>
    tpu.vector_store %arg5[%c0_15, %c0_16], %26 {strides = array<i32>} : memref<64x8xbf16, #tpu.memory_space<vmem>>, vector<64x8xbf16>,
    return
  }
  func.func @transform_0(%arg0: i32) -> (i32, i32, i32) {
    %c0_i32 = arith.constant 0 : i32
    %c0_i32_0 = arith.constant 0 : i32
    %c0_i32_1 = arith.constant 0 : i32
    return %c0_i32, %arg0, %c0_i32_0 : i32, i32, i32
  }
  func.func @transform_1(%arg0: i32) -> (i32, i32) {
    %c0_i32 = arith.constant 0 : i32
    %c0_i32_0 = arith.constant 0 : i32
    %c0_i32_1 = arith.constant 0 : i32
    return %c0_i32, %c0_i32_0 : i32, i32
  }
  func.func @transform_2(%arg0: i32) -> (i32, i32) {
    %c0_i32 = arith.constant 0 : i32
    %c0_i32_0 = arith.constant 0 : i32
    %c0_i32_1 = arith.constant 0 : i32
    return %c0_i32, %c0_i32_0 : i32, i32
  }
  func.func @transform_3(%arg0: i32) -> (i32, i32) {
    %c0_i32 = arith.constant 0 : i32
    %c0_i32_0 = arith.constant 0 : i32
    %c0_i32_1 = arith.constant 0 : i32
    return %c0_i32, %c0_i32_0 : i32, i32
  }
  func.func @transform_4(%arg0: i32) -> (i32, i32) {
    %c0_i32 = arith.constant 0 : i32
    %c0_i32_0 = arith.constant 0 : i32
    return %arg0, %c0_i32 : i32, i32
  }
}

module attributes {stable_mosaic.version = 11 : i64} {
  func.func @_conv_bn_act_pool_kernel(%arg0: i32, %arg1: memref<4x16x128xbf16, #tpu.memory_space<vmem>>, %arg2: memref<128x16xbf16, #tpu.memory_space<vmem>>, %arg3: memref<1x16xf32, #tpu.memory_space<vmem>>, %arg4: memref<1x16xf32, #tpu.memory_space<vmem>>, %arg5: memref<16x16xbf16, #tpu.memory_space<vmem>>) attributes {dimension_semantics = [#tpu.dimension_semantics<parallel>], iteration_bounds = array<i64: 1>, scalar_prefetch = 0 : i64, scratch_operands = 0 : i64, tpu.core_type = #tpu.core_type<tc>, window_params = [{transform_indices = @transform_0, window_bounds = array<i64: 4, 16, 128>}, {pipeline_mode = #tpu.pipeline_mode<synchronous>, transform_indices = @transform_1, window_bounds = array<i64: 128, 16>}, {pipeline_mode = #tpu.pipeline_mode<synchronous>, transform_indices = @transform_2, window_bounds = array<i64: 1, 16>}, {pipeline_mode = #tpu.pipeline_mode<synchronous>, transform_indices = @transform_3, window_bounds = array<i64: 1, 16>}, {transform_indices = @transform_4, window_bounds = array<i64: 16, 16>}]} {
    %c0 = arith.constant 0 : index
    %c0_0 = arith.constant 0 : index
    %c0_1 = arith.constant 0 : index
    %0 = vector.load %arg1[%c0, %c0_0, %c0_1] : memref<4x16x128xbf16, #tpu.memory_space<vmem>>, vector<1x16x128xbf16>
    %1 = vector.shape_cast %0 : vector<1x16x128xbf16> to vector<16x128xbf16>
    %c1 = arith.constant 1 : index
    %c0_2 = arith.constant 0 : index
    %c0_3 = arith.constant 0 : index
    %2 = vector.load %arg1[%c1, %c0_2, %c0_3] : memref<4x16x128xbf16, #tpu.memory_space<vmem>>, vector<1x16x128xbf16>
    %3 = vector.shape_cast %2 : vector<1x16x128xbf16> to vector<16x128xbf16>
    %c2 = arith.constant 2 : index
    %c0_4 = arith.constant 0 : index
    %c0_5 = arith.constant 0 : index
    %4 = vector.load %arg1[%c2, %c0_4, %c0_5] : memref<4x16x128xbf16, #tpu.memory_space<vmem>>, vector<1x16x128xbf16>
    %5 = vector.shape_cast %4 : vector<1x16x128xbf16> to vector<16x128xbf16>
    %c3 = arith.constant 3 : index
    %c0_6 = arith.constant 0 : index
    %c0_7 = arith.constant 0 : index
    %6 = vector.load %arg1[%c3, %c0_6, %c0_7] : memref<4x16x128xbf16, #tpu.memory_space<vmem>>, vector<1x16x128xbf16>
    %7 = vector.shape_cast %6 : vector<1x16x128xbf16> to vector<16x128xbf16>
    %8 = tpu.concatenate %1, %3, %5, %7 in 0 : vector<16x128xbf16>, vector<16x128xbf16>, vector<16x128xbf16>, vector<16x128xbf16> -> vector<64x128xbf16>
    %c0_8 = arith.constant 0 : index
    %c0_9 = arith.constant 0 : index
    %9 = vector.load %arg2[%c0_8, %c0_9] : memref<128x16xbf16, #tpu.memory_space<vmem>>, vector<128x16xbf16>
    %cst = arith.constant dense<0.000000e+00> : vector<64x16xf32>
    %10 = tpu.matmul %8, %9, %cst {dimension_numbers = #tpu.dot_dimension_numbers<[1], [0], [0], [1], [0, 0, 1, 1], [], []>} : vector<64x128xbf16>, vector<128x16xbf16>, vector<64x16xf32> -> vector<64x16xf32>
    %c0_10 = arith.constant 0 : index
    %c0_11 = arith.constant 0 : index
    %11 = vector.load %arg3[%c0_10, %c0_11] : memref<1x16xf32, #tpu.memory_space<vmem>>, vector<1x16xf32>
    %12 = vector.broadcast %11 : vector<1x16xf32> to vector<64x16xf32>
    %13 = arith.mulf %10, %12 : vector<64x16xf32>
    %c0_12 = arith.constant 0 : index
    %c0_13 = arith.constant 0 : index
    %14 = vector.load %arg4[%c0_12, %c0_13] : memref<1x16xf32, #tpu.memory_space<vmem>>, vector<1x16xf32>
    %15 = vector.broadcast %14 : vector<1x16xf32> to vector<64x16xf32>
    %16 = arith.addf %13, %15 : vector<64x16xf32>
    %17 = vector.extract_strided_slice %16 {offsets = [0, 0], sizes = [16, 16], strides = [1, 1]} : vector<64x16xf32> to vector<16x16xf32>
    %18 = vector.extract_strided_slice %16 {offsets = [16, 0], sizes = [16, 16], strides = [1, 1]} : vector<64x16xf32> to vector<16x16xf32>
    %19 = arith.maximumf %17, %18 : vector<16x16xf32>
    %20 = vector.extract_strided_slice %16 {offsets = [32, 0], sizes = [16, 16], strides = [1, 1]} : vector<64x16xf32> to vector<16x16xf32>
    %21 = vector.extract_strided_slice %16 {offsets = [48, 0], sizes = [16, 16], strides = [1, 1]} : vector<64x16xf32> to vector<16x16xf32>
    %22 = arith.maximumf %20, %21 : vector<16x16xf32>
    %23 = arith.maximumf %19, %22 : vector<16x16xf32>
    %cst_14 = arith.constant 0.000000e+00 : f32
    %24 = vector.broadcast %cst_14 : f32 to vector<16x16xf32>
    %25 = arith.maximumf %23, %24 : vector<16x16xf32>
    %26 = arith.truncf %25 : vector<16x16xf32> to vector<16x16xbf16>
    %c0_15 = arith.constant 0 : index
    %c0_16 = arith.constant 0 : index
    %27 = vector.load %arg5[%c0_15, %c0_16] : memref<16x16xbf16, #tpu.memory_space<vmem>>, vector<16x16xbf16>
    tpu.vector_store %arg5[%c0_15, %c0_16], %26 {strides = array<i32>} : memref<16x16xbf16, #tpu.memory_space<vmem>>, vector<16x16xbf16>,
    return
  }
  func.func @transform_0(%arg0: i32) -> (i32, i32, i32) {
    %c0_i32 = arith.constant 0 : i32
    %c0_i32_0 = arith.constant 0 : i32
    %c0_i32_1 = arith.constant 0 : i32
    return %c0_i32, %arg0, %c0_i32_0 : i32, i32, i32
  }
  func.func @transform_1(%arg0: i32) -> (i32, i32) {
    %c0_i32 = arith.constant 0 : i32
    %c0_i32_0 = arith.constant 0 : i32
    %c0_i32_1 = arith.constant 0 : i32
    return %c0_i32, %c0_i32_0 : i32, i32
  }
  func.func @transform_2(%arg0: i32) -> (i32, i32) {
    %c0_i32 = arith.constant 0 : i32
    %c0_i32_0 = arith.constant 0 : i32
    %c0_i32_1 = arith.constant 0 : i32
    return %c0_i32, %c0_i32_0 : i32, i32
  }
  func.func @transform_3(%arg0: i32) -> (i32, i32) {
    %c0_i32 = arith.constant 0 : i32
    %c0_i32_0 = arith.constant 0 : i32
    %c0_i32_1 = arith.constant 0 : i32
    return %c0_i32, %c0_i32_0 : i32, i32
  }
  func.func @transform_4(%arg0: i32) -> (i32, i32) {
    %c0_i32 = arith.constant 0 : i32
    %c0_i32_0 = arith.constant 0 : i32
    return %arg0, %c0_i32 : i32, i32
  }
}

module attributes {stable_mosaic.version = 11 : i64} {
  func.func @_conv3_fc_kernel(%arg0: i32, %arg1: memref<16x256xbf16, #tpu.memory_space<vmem>>, %arg2: memref<256x32xbf16, #tpu.memory_space<vmem>>, %arg3: memref<1x32xf32, #tpu.memory_space<vmem>>, %arg4: memref<1x32xf32, #tpu.memory_space<vmem>>, %arg5: memref<32x1024xbf16, #tpu.memory_space<vmem>>, %arg6: memref<1x1024xf32, #tpu.memory_space<vmem>>, %arg7: memref<1024x10xbf16, #tpu.memory_space<vmem>>, %arg8: memref<1x10xf32, #tpu.memory_space<vmem>>, %arg9: memref<16x10xf32, #tpu.memory_space<vmem>>) attributes {dimension_semantics = [#tpu.dimension_semantics<parallel>], iteration_bounds = array<i64: 1>, scalar_prefetch = 0 : i64, scratch_operands = 0 : i64, tpu.core_type = #tpu.core_type<tc>, window_params = [{transform_indices = @transform_0, window_bounds = array<i64: 16, 256>}, {pipeline_mode = #tpu.pipeline_mode<synchronous>, transform_indices = @transform_1, window_bounds = array<i64: 256, 32>}, {pipeline_mode = #tpu.pipeline_mode<synchronous>, transform_indices = @transform_2, window_bounds = array<i64: 1, 32>}, {pipeline_mode = #tpu.pipeline_mode<synchronous>, transform_indices = @transform_3, window_bounds = array<i64: 1, 32>}, {pipeline_mode = #tpu.pipeline_mode<synchronous>, transform_indices = @transform_4, window_bounds = array<i64: 32, 1024>}, {pipeline_mode = #tpu.pipeline_mode<synchronous>, transform_indices = @transform_5, window_bounds = array<i64: 1, 1024>}, {pipeline_mode = #tpu.pipeline_mode<synchronous>, transform_indices = @transform_6, window_bounds = array<i64: 1024, 10>}, {pipeline_mode = #tpu.pipeline_mode<synchronous>, transform_indices = @transform_7, window_bounds = array<i64: 1, 10>}, {transform_indices = @transform_8, window_bounds = array<i64: 16, 10>}]} {
    %c0 = arith.constant 0 : index
    %c0_0 = arith.constant 0 : index
    %0 = vector.load %arg1[%c0, %c0_0] : memref<16x256xbf16, #tpu.memory_space<vmem>>, vector<16x256xbf16>
    %c0_1 = arith.constant 0 : index
    %c0_2 = arith.constant 0 : index
    %1 = vector.load %arg2[%c0_1, %c0_2] : memref<256x32xbf16, #tpu.memory_space<vmem>>, vector<256x32xbf16>
    %cst = arith.constant dense<0.000000e+00> : vector<16x32xf32>
    %2 = tpu.matmul %0, %1, %cst {dimension_numbers = #tpu.dot_dimension_numbers<[1], [0], [0], [1], [0, 0, 1, 1], [], []>} : vector<16x256xbf16>, vector<256x32xbf16>, vector<16x32xf32> -> vector<16x32xf32>
    %c0_3 = arith.constant 0 : index
    %c0_4 = arith.constant 0 : index
    %3 = vector.load %arg3[%c0_3, %c0_4] : memref<1x32xf32, #tpu.memory_space<vmem>>, vector<1x32xf32>
    %4 = vector.broadcast %3 : vector<1x32xf32> to vector<16x32xf32>
    %5 = arith.mulf %2, %4 : vector<16x32xf32>
    %c0_5 = arith.constant 0 : index
    %c0_6 = arith.constant 0 : index
    %6 = vector.load %arg4[%c0_5, %c0_6] : memref<1x32xf32, #tpu.memory_space<vmem>>, vector<1x32xf32>
    %7 = vector.broadcast %6 : vector<1x32xf32> to vector<16x32xf32>
    %8 = arith.addf %5, %7 : vector<16x32xf32>
    %cst_7 = arith.constant 0.000000e+00 : f32
    %9 = vector.broadcast %cst_7 : f32 to vector<16x32xf32>
    %10 = arith.maximumf %8, %9 : vector<16x32xf32>
    %11 = arith.truncf %10 : vector<16x32xf32> to vector<16x32xbf16>
    %c0_8 = arith.constant 0 : index
    %c0_9 = arith.constant 0 : index
    %12 = vector.load %arg5[%c0_8, %c0_9] : memref<32x1024xbf16, #tpu.memory_space<vmem>>, vector<32x1024xbf16>
    %cst_10 = arith.constant dense<0.000000e+00> : vector<16x1024xf32>
    %13 = tpu.matmul %11, %12, %cst_10 {dimension_numbers = #tpu.dot_dimension_numbers<[1], [0], [0], [1], [0, 0, 1, 1], [], []>} : vector<16x32xbf16>, vector<32x1024xbf16>, vector<16x1024xf32> -> vector<16x1024xf32>
    %c0_11 = arith.constant 0 : index
    %c0_12 = arith.constant 0 : index
    %14 = vector.load %arg6[%c0_11, %c0_12] : memref<1x1024xf32, #tpu.memory_space<vmem>>, vector<1x1024xf32>
    %15 = vector.broadcast %14 : vector<1x1024xf32> to vector<16x1024xf32>
    %16 = arith.addf %13, %15 : vector<16x1024xf32>
    %cst_13 = arith.constant 0.000000e+00 : f32
    %17 = vector.broadcast %cst_13 : f32 to vector<16x1024xf32>
    %18 = arith.maximumf %16, %17 : vector<16x1024xf32>
    %19 = arith.truncf %18 : vector<16x1024xf32> to vector<16x1024xbf16>
    %c0_14 = arith.constant 0 : index
    %c0_15 = arith.constant 0 : index
    %20 = vector.load %arg7[%c0_14, %c0_15] : memref<1024x10xbf16, #tpu.memory_space<vmem>>, vector<1024x10xbf16>
    %cst_16 = arith.constant dense<0.000000e+00> : vector<16x10xf32>
    %21 = tpu.matmul %19, %20, %cst_16 {dimension_numbers = #tpu.dot_dimension_numbers<[1], [0], [0], [1], [0, 0, 1, 1], [], []>} : vector<16x1024xbf16>, vector<1024x10xbf16>, vector<16x10xf32> -> vector<16x10xf32>
    %c0_17 = arith.constant 0 : index
    %c0_18 = arith.constant 0 : index
    %22 = vector.load %arg8[%c0_17, %c0_18] : memref<1x10xf32, #tpu.memory_space<vmem>>, vector<1x10xf32>
    %23 = vector.broadcast %22 : vector<1x10xf32> to vector<16x10xf32>
    %24 = arith.addf %21, %23 : vector<16x10xf32>
    %c0_19 = arith.constant 0 : index
    %c0_20 = arith.constant 0 : index
    %25 = vector.load %arg9[%c0_19, %c0_20] : memref<16x10xf32, #tpu.memory_space<vmem>>, vector<16x10xf32>
    tpu.vector_store %arg9[%c0_19, %c0_20], %24 {strides = array<i32>} : memref<16x10xf32, #tpu.memory_space<vmem>>, vector<16x10xf32>,
    return
  }
  func.func @transform_0(%arg0: i32) -> (i32, i32) {
    %c0_i32 = arith.constant 0 : i32
    %c0_i32_0 = arith.constant 0 : i32
    return %arg0, %c0_i32 : i32, i32
  }
  func.func @transform_1(%arg0: i32) -> (i32, i32) {
    %c0_i32 = arith.constant 0 : i32
    %c0_i32_0 = arith.constant 0 : i32
    %c0_i32_1 = arith.constant 0 : i32
    return %c0_i32, %c0_i32_0 : i32, i32
  }
  func.func @transform_2(%arg0: i32) -> (i32, i32) {
    %c0_i32 = arith.constant 0 : i32
    %c0_i32_0 = arith.constant 0 : i32
    %c0_i32_1 = arith.constant 0 : i32
    return %c0_i32, %c0_i32_0 : i32, i32
  }
  func.func @transform_3(%arg0: i32) -> (i32, i32) {
    %c0_i32 = arith.constant 0 : i32
    %c0_i32_0 = arith.constant 0 : i32
    %c0_i32_1 = arith.constant 0 : i32
    return %c0_i32, %c0_i32_0 : i32, i32
  }
  func.func @transform_4(%arg0: i32) -> (i32, i32) {
    %c0_i32 = arith.constant 0 : i32
    %c0_i32_0 = arith.constant 0 : i32
    %c0_i32_1 = arith.constant 0 : i32
    return %c0_i32, %c0_i32_0 : i32, i32
  }
  func.func @transform_5(%arg0: i32) -> (i32, i32) {
    %c0_i32 = arith.constant 0 : i32
    %c0_i32_0 = arith.constant 0 : i32
    %c0_i32_1 = arith.constant 0 : i32
    return %c0_i32, %c0_i32_0 : i32, i32
  }
  func.func @transform_6(%arg0: i32) -> (i32, i32) {
    %c0_i32 = arith.constant 0 : i32
    %c0_i32_0 = arith.constant 0 : i32
    %c0_i32_1 = arith.constant 0 : i32
    return %c0_i32, %c0_i32_0 : i32, i32
  }
  func.func @transform_7(%arg0: i32) -> (i32, i32) {
    %c0_i32 = arith.constant 0 : i32
    %c0_i32_0 = arith.constant 0 : i32
    %c0_i32_1 = arith.constant 0 : i32
    return %c0_i32, %c0_i32_0 : i32, i32
  }
  func.func @transform_8(%arg0: i32) -> (i32, i32) {
    %c0_i32 = arith.constant 0 : i32
    %c0_i32_0 = arith.constant 0 : i32
    return %arg0, %c0_i32 : i32, i32
  }
}

</mosaic_0001>

<bundles_post_ra>
// kernel: artisanal_cnn_forward.3
= control target key start
LH: loop header
LB: loop body
LE: loop exit
PB: predicated region body
PF: predicated region fallthrough
CT: control target
= control target key end

     0   :  { %s1177_s15 = smov 0   ;;  %s1179_s16 = smov 0   ;;  %s1415_s0 = inlined_call_operand.vmem [shape: bf16[4,128,48], index: 0, kind: input, shape index: {}]   ;;  %s1416_s1 = inlined_call_operand.vmem [shape: bf16[48,8], index: 1, kind: input, shape index: {}]   ;;  %s1417_s2 = inlined_call_operand.vmem [shape: f32[1,8], index: 2, kind: input, shape index: {}]   ;;  %s1418_s3 = inlined_call_operand.vmem [shape: f32[1,8], index: 3, kind: input, shape index: {}]   ;;  %s1419_s4 = inlined_call_operand.vmem [shape: bf16[128,8], index: 4, kind: output, shape index: {}]  }
   0x1   :  { %s1181_s17 = smov 0  }
   0x2 LB: > { %s931_s18 = sadd.s32 4294967295, %s1150_s17   ;;  %s1194_s19 = sadd.s32 1, %s1150_s17   ;;  %s1150_s17 = sphi %s1181_s17, %s1422_s17   ;;  %s1146_s16 = sphi %s1179_s16, %s1421_s16   ;;  %s1142_s15 = sphi %s1177_s15, %s1420_s15  }
   0x3   : > { %s18_s20 = ssub.s32 %s1150_s17, %s1194_s19  ;;  %s21_s21 = sadd.s32 1, %s1146_s16 }
   0x4   : > { %p19_p0 = scmp.eq.s32.totalorder %s18_s20, 0  ;;  %p28_p1 = scmp.ne.s32.totalorder %s1146_s16, %s1142_s15 }
   0x5   : > { %p29_p2 = scmp.eq.s32.totalorder %s1150_s17, 0  ;;  %p934_p4 = scmp.ge.s32.totalorder %s1150_s17, 2 }
   0x6   : > { %s1203_s22 = scalar_select %p19_p0, %s1146_s16, %s21_s21  }
   0x7   : > { %p30_p3 = por %p29_p2, %p28_p1  ;;  %152 = sbr.rel (%p934_p4) target bundleno = 24 (0x18), region = 28 }
   0xc   : > { %155 = sbr.rel (!%p30_p3) target bundleno = 24 (0x18), region = 32  ;;  %s157_s23 = sand.u32 (%p30_p3), 1, %s1146_s16  }
   0xd   : > { %s1013_s24 = sshll.u32 (%p30_p3), %s1150_s17, 5  ;;  %s935_s25 = sshll.u32 (%p30_p3), %s157_s23, 7 }
   0xe   : > { %s1211_s28 = scalar_lea.vmem (%p30_p3), %s1415_s0, %s1013_s24  ;;  %s159_s29 = scalar_lea.vmem (%p30_p3), [#allocation2], %s935_s25 }
   0xf   : > { %v179_v0 = vld [vmem:[%s1211_s28] sm:$0xff] (%p30_p3)   ;;  %v183_v1 = vld [vmem:[%s1211_s28 + $0x8] sm:$0xff] (%p30_p3)   ;;  %v187_v2 = vld [vmem:[%s1211_s28 + $0x10] sm:$0xff] (%p30_p3)  }
  0x10   : > { %180 = vst [vmem:[%s159_s29] sm:$0xff] (%p30_p3), %v179_v0   ;;  %184 = vst [vmem:[%s159_s29 + $0x8] sm:$0xff] (%p30_p3), %v183_v1   ;;  %v191_v3 = vld [vmem:[%s1211_s28 + $0x18] sm:$0xff] (%p30_p3)   ;;  %v195_v4 = vld [vmem:[%s1211_s28 + $0x40] sm:$0xff] (%p30_p3)  }
  0x11   : > { %188 = vst [vmem:[%s159_s29 + $0x10] sm:$0xff] %v187_v2   ;;  %v199_v5 = vld [vmem:[%s1211_s28 + $0x48] sm:$0xff]   ;;  %192 = vst [vmem:[%s159_s29 + $0x18] sm:$0xff] %v191_v3   ;;  %v203_v6 = vld [vmem:[%s1211_s28 + $0x50] sm:$0xff]  }
  0x12   : > { %196 = vst [vmem:[%s159_s29 + $0x20] sm:$0xff] %v195_v4   ;;  %200 = vst [vmem:[%s159_s29 + $0x28] sm:$0xff] %v199_v5   ;;  %v207_v7 = vld [vmem:[%s1211_s28 + $0x58] sm:$0xff]   ;;  %v211_v8 = vld [vmem:[%s1211_s28 + $0x80] sm:$0xff]  }
  0x13   : > { %204 = vst [vmem:[%s159_s29 + $0x30] sm:$0xff] %v203_v6   ;;  %208 = vst [vmem:[%s159_s29 + $0x38] sm:$0xff] %v207_v7   ;;  %v215_v9 = vld [vmem:[%s1211_s28 + $0x88] sm:$0xff]   ;;  %v219_v10 = vld [vmem:[%s1211_s28 + $0x90] sm:$0xff]  }
  0x14   : > { %212 = vst [vmem:[%s159_s29 + $0x40] sm:$0xff] %v211_v8   ;;  %v223_v11 = vld [vmem:[%s1211_s28 + $0x98] sm:$0xff]   ;;  %216 = vst [vmem:[%s159_s29 + $0x48] sm:$0xff] %v215_v9   ;;  %v227_v12 = vld [vmem:[%s1211_s28 + $0xc0] sm:$0xff]  }
  0x15   : > { %220 = vst [vmem:[%s159_s29 + $0x50] sm:$0xff] %v219_v10   ;;  %224 = vst [vmem:[%s159_s29 + $0x58] sm:$0xff] %v223_v11   ;;  %v231_v13 = vld [vmem:[%s1211_s28 + $0xc8] sm:$0xff]   ;;  %v235_v14 = vld [vmem:[%s1211_s28 + $0xd0] sm:$0xff]  }
  0x16   : > { %228 = vst [vmem:[%s159_s29 + $0x60] sm:$0xff] %v227_v12   ;;  %232 = vst [vmem:[%s159_s29 + $0x68] sm:$0xff] %v231_v13   ;;  %v239_v15 = vld [vmem:[%s1211_s28 + $0xd8] sm:$0xff]  }
  0x17   : > { %236 = vst [vmem:[%s159_s29 + $0x70] sm:$0xff] %v235_v14   ;;  %240 = vst [vmem:[%s159_s29 + $0x78] sm:$0xff] %v239_v15  }
  0x18 PF: > { %p938_p5 = scmp.ge.s32.totalorder %s1150_s17, 1  ;;  %p329_p6 = scmp.lt.s32.totalorder %s1150_s17, 3 }
  0x1a   : > { %p330_p7 = pnand %p938_p5, %p329_p6 }
  0x1b   : > { %s336_s6 = sand.u32 (!%p330_p7), 1, %s1142_s15   ;;  %s1291_s21 = sshll.u32 (!%p330_p7), %s931_s18, 3 }
  0x1c   : > { %333 = sbr.rel (%p330_p7) target bundleno = 285 (0x11d), region = 73  ;;  %s939_s9 = sshll.u32 (!%p330_p7), %s336_s6, 7 }
  0x1d   : > { %s1241_s12 = scalar_lea.vmem (!%p330_p7), [#allocation2], %s939_s9  ;;  %p363_p8 = scmp.lt.s32.totalorder (!%p330_p7), %s1291_s21, 15 }
  0x21   : > { %v1109_v16 = vld [vmem:[%s1416_s1 + $0x10] sm:$0xff]   ;;  %v1110_v17 = vld [vmem:[%s1416_s1 + $0x8] sm:$0xff]   ;;  %v1111_v18 = vld [vmem:[%s1416_s1] sm:$0xff]   ;;  %vm508_vm0 = vcmask 392192   ;;  %vm860_vm1 = vcmask 60416   ;;  %s1424_s21 = smov (!%p363_p8, %s1291_s21), 15 }
  0x22   : > { %1041 = vmatprep.subr.bf16.mxu0 %v1109_v16  ;;  %1079 = vmatprep.subr.bf16.mxu1 %v1109_v16  ;;  %v1112_v19 = vld [vmem:[%s1241_s12] sm:$0xff]   ;;  %v1114_v21 = vld [vmem:[%s1241_s12 + $0x8] sm:$0xff]   ;;  %v1116_v23 = vld [vmem:[%s1241_s12 + $0x10] sm:$0xff]   ;;  %s941_s17 = sshll.u32 %s1424_s21, 2 }
  0x23   : > { %1042 = vmatpush3.bf16.msra.mxu0 %v1109_v16  ;;  %1082 = vmatpush3.bf16.msra.mxu1 %v1109_v16  ;;  %v1113_v20 = vld [vmem:[%s1241_s12 + $0x40] sm:$0xff]   ;;  %v1115_v22 = vld [vmem:[%s1241_s12 + $0x48] sm:$0xff]   ;;  %v1117_v24 = vld [vmem:[%s1241_s12 + $0x50] sm:$0xff]   ;;  %s1361_s24 = scalar_lea.vmem %s1419_s4, %s941_s17 }
  0x24   : > { %1043 = vmatprep.subr.bf16.mxu0 %v1110_v17  ;;  %1080 = vmatprep.subr.bf16.mxu1 %v1110_v17  ;;  %v1118_v25 = vld [vmem:[%s1241_s12 + $0x18] sm:$0xff]   ;;  %v1120_v27 = vld [vmem:[%s1241_s12 + $0x20] sm:$0xff]   ;;  %v1122_v29 = vld [vmem:[%s1241_s12 + $0x28] sm:$0xff]  }
  0x25   : > { %1047 = vmatprep.mubr.msk.bf16.mxu0 %vm508_vm0, %v1112_v19  ;;  %1063 = vmatprep.mubr.msk.bf16.mxu1 %vm508_vm0, %v1113_v20  ;;  %v1119_v26 = vld [vmem:[%s1241_s12 + $0x58] sm:$0xff]   ;;  %v1121_v28 = vld [vmem:[%s1241_s12 + $0x60] sm:$0xff]   ;;  %v1123_v30 = vld [vmem:[%s1241_s12 + $0x68] sm:$0xff]  }
  0x26   : > { %v1124_v31 = vld [vmem:[%s1241_s12 + $0x30] sm:$0xff]   ;;  %v1126_v33 = vld [vmem:[%s1241_s12 + $0x38] sm:$0xff]   ;;  %v1278_v43 = vld [vmem:[%s1417_s2] ss:$0 sm:$0xff] }
  0x27   : > { %1044 = vmatpush3.bf16.msra.mxu0 %v1110_v17  ;;  %1083 = vmatpush3.bf16.msra.mxu1 %v1110_v17  ;;  %v1125_v32 = vld [vmem:[%s1241_s12 + $0x70] sm:$0xff]   ;;  %v1127_v34 = vld [vmem:[%s1241_s12 + $0x78] sm:$0xff]   ;;  %v1287_v52 = vld [vmem:[%s1418_s3] ss:$0 sm:$0xff] }
  0x28   : > { %1045 = vmatprep.subr.bf16.mxu0 %v1111_v18  ;;  %1081 = vmatprep.subr.bf16.mxu1 %v1111_v18 }
  0x2b   : > { %1046 = vmatpush3.bf16.msra.mxu0 %v1111_v18  ;;  %1084 = vmatpush3.bf16.msra.mxu1 %v1111_v18 }
  0x2e   : > { %1048 = vmatmul.mubr.msk.bf16.vlgmr.msra.gmra.mxu0 %vm508_vm0, %v1114_v21  ;;  %1064 = vmatmul.mubr.msk.bf16.vlgmr.msra.gmra.mxu1 %vm508_vm0, %v1115_v22 }
  0x2f   : > { %1051 = vmatprep.mubr.msk.bf16.mxu0 %vm508_vm0, %v1116_v23  ;;  %1067 = vmatprep.mubr.msk.bf16.mxu1 %vm508_vm0, %v1117_v24 }
  0x36   : > { %1052 = vmatmul.mubr.msk.bf16.gmra.mxu0 %vm508_vm0, %v1118_v25  ;;  %1068 = vmatmul.mubr.msk.bf16.gmra.mxu1 %vm508_vm0, %v1119_v26 }
  0x37   : > { %1055 = vmatprep.mubr.msk.bf16.mxu0 %vm508_vm0, %v1120_v27  ;;  %1071 = vmatprep.mubr.msk.bf16.mxu1 %vm508_vm0, %v1121_v28 }
  0x3e   : > { %1056 = vmatmul.mubr.msk.bf16.gmra.mxu0 %vm508_vm0, %v1122_v29  ;;  %1072 = vmatmul.mubr.msk.bf16.gmra.mxu1 %vm508_vm0, %v1123_v30 }
  0x3f   : > { %1059 = vmatprep.mubr.msk.bf16.mxu0 %vm508_vm0, %v1124_v31  ;;  %1075 = vmatprep.mubr.msk.bf16.mxu1 %vm508_vm0, %v1125_v32 }
  0x46   : > { %1060 = vmatmul.mubr.msk.bf16.gmra.mxu0 %vm508_vm0, %v1126_v33  ;;  %1076 = vmatmul.mubr.msk.bf16.gmra.mxu1 %vm508_vm0, %v1127_v34 }
  0xee   : > { %v1049_v35 = vpop.f32.mrf.mxu0  ;;  %v1065_v36 = vpop.f32.mrf.mxu1 }
  0xef   : > { %v727_v48 = vmul.f32 %v1049_v35, %v1278_v43  ;;  %v743_v49 = vmul.f32 %v1065_v36, %v1278_v43 }
  0xf0   : > { %v591_v37 = vpop.f32.mrf.mxu0  ;;  %v655_v38 = vpop.f32.mrf.mxu1 }
  0xf1   : > { %v725_v50 = vmul.f32 %v1278_v43, %v591_v37  ;;  %v741_v51 = vmul.f32 %v1278_v43, %v655_v38  ;;  %v766_v62 = vadd.f32 %v1287_v52, %v727_v48  ;;  %v782_v63 = vadd.f32 %v1287_v52, %v743_v49 }
  0xf2   : > { %v1050_v39 = vpop.f32.mrf.mxu0  ;;  %v1066_v40 = vpop.f32.mrf.mxu1 }
  0xf3   : > { %v728_v55 = vmul.f32 %v1050_v39, %v1278_v43  ;;  %v744_v56 = vmul.f32 %v1066_v40, %v1278_v43  ;;  %v764_v0 = vadd.f32 %v1287_v52, %v725_v50  ;;  %v780_v1 = vadd.f32 %v1287_v52, %v741_v51 }
  0xf4   : > { %v594_v41 = vpop.f32.mrf.mxu0  ;;  %v658_v42 = vpop.f32.mrf.mxu1 }
  0xf5   : > { %v726_v57 = vmul.f32 %v1278_v43, %v594_v41  ;;  %v742_v58 = vmul.f32 %v1278_v43, %v658_v42  ;;  %v767_v8 = vadd.f32 %v1287_v52, %v728_v55  ;;  %v783_v9 = vadd.f32 %v1287_v52, %v744_v56 }
  0xf6   : > { %v1053_v44 = vpop.f32.mrf.mxu0  ;;  %v1069_v45 = vpop.f32.mrf.mxu1 }
  0xf7   : > { %v731_v59 = vmul.f32 %v1053_v44, %v1278_v43  ;;  %v747_v2 = vmul.f32 %v1069_v45, %v1278_v43  ;;  %v1312_v12 = vadd.f32 %v1287_v52, %v726_v57  ;;  %v1315_v13 = vadd.f32 %v1287_v52, %v742_v58 }
  0xf8   : > { %v607_v46 = vpop.f32.mrf.mxu0  ;;  %v671_v47 = vpop.f32.mrf.mxu1 }
  0xf9   : > { %v729_v3 = vmul.f32 %v1278_v43, %v607_v46  ;;  %v745_v4 = vmul.f32 %v1278_v43, %v671_v47  ;;  %v1318_v14 = vadd.f32 %v1287_v52, %v731_v59  ;;  %v1331_v22 = vadd.f32 %v1287_v52, %v747_v2 }
  0xfa   : > { %v1054_v53 = vpop.f32.mrf.mxu0  ;;  %v1070_v54 = vpop.f32.mrf.mxu1 }
  0xfb   : > { %v732_v5 = vmul.f32 %v1054_v53, %v1278_v43  ;;  %v748_v15 = vmul.f32 %v1070_v54, %v1278_v43  ;;  %v1334_v23 = vadd.f32 %v1287_v52, %v729_v3  ;;  %v1337_v24 = vadd.f32 %v1287_v52, %v745_v4 }
  0xfc   : > { %v610_v60 = vpop.f32.mrf.mxu0  ;;  %v674_v61 = vpop.f32.mrf.mxu1 }
  0xfd   : > { %v1340_v25 = vadd.f32 %v1287_v52, %v732_v5  ;;  %v1345_v32 = vadd.f32 %v1287_v52, %v748_v15  ;;  %v730_v33 = vmul.f32 %v1278_v43, %v610_v60  ;;  %v746_v42 = vmul.f32 %v1278_v43, %v674_v61 }
  0xfe   : > { %v1057_v6 = vpop.f32.mrf.mxu0  ;;  %v1073_v7 = vpop.f32.mrf.mxu1 }
  0xff   : > { %v735_v10 = vmul.f32 %v1057_v6, %v1278_v43  ;;  %v751_v11 = vmul.f32 %v1073_v7, %v1278_v43 }
 0x100   : > { %v623_v16 = vpop.f32.mrf.mxu0  ;;  %v687_v17 = vpop.f32.mrf.mxu1 }
 0x101   : > { %v774_v18 = vadd.f32 %v1287_v52, %v735_v10  ;;  %v790_v19 = vadd.f32 %v1287_v52, %v751_v11  ;;  %v733_v20 = vmul.f32 %v1278_v43, %v623_v16  ;;  %v749_v21 = vmul.f32 %v1278_v43, %v687_v17 }
 0x102   : > { %v1058_v26 = vpop.f32.mrf.mxu0  ;;  %v1074_v27 = vpop.f32.mrf.mxu1 }
 0x103   : > { %v798_v28 = vmax.f32 %v766_v62, %v774_v18  ;;  %v806_v29 = vmax.f32 %v782_v63, %v790_v19  ;;  %v772_v30 = vadd.f32 %v1287_v52, %v733_v20  ;;  %v788_v31 = vadd.f32 %v1287_v52, %v749_v21 }
 0x104   : > { %v736_v34 = vmul.f32 %v1058_v26, %v1278_v43  ;;  %v752_v35 = vmul.f32 %v1074_v27, %v1278_v43  ;;  %v626_v36 = vpop.f32.mrf.mxu0  ;;  %v690_v37 = vpop.f32.mrf.mxu1 }
 0x105   : > { %v814_v38 = vmax.f32 %v798_v28, %v806_v29  ;;  %v796_v39 = vmax.f32 %v764_v0, %v772_v30  ;;  %v804_v40 = vmax.f32 %v780_v1, %v788_v31  ;;  %v734_v41 = vmul.f32 %v1278_v43, %v626_v36 }
 0x106   : > { %v775_v44 = vadd.f32 %v1287_v52, %v736_v34  ;;  %v791_v45 = vadd.f32 %v1287_v52, %v752_v35  ;;  %v750_v46 = vmul.f32 %v1278_v43, %v690_v37  ;;  %v1061_v47 = vpop.f32.mrf.mxu0  ;;  %v1077_v48 = vpop.f32.mrf.mxu1  ;;  %v769_v31 = vadd.f32 %v1287_v52, %v730_v33 }
 0x107   : > { %v822_v49 = vmax.f32 %v814_v38, 0.0  ;;  %v812_v50 = vmax.f32 %v796_v39, %v804_v40  ;;  %v773_v51 = vadd.f32 %v1287_v52, %v734_v41  ;;  %v739_v53 = vmul.f32 %v1061_v47, %v1278_v43 }
 0x108   : > { %v799_v54 = vmax.f32 %v767_v8, %v775_v44  ;;  %v807_v55 = vmax.f32 %v783_v9, %v791_v45  ;;  %v789_v56 = vadd.f32 %v1287_v52, %v750_v46  ;;  %v755_v57 = vmul.f32 %v1077_v48, %v1278_v43  ;;  %v639_v58 = vpop.f32.mrf.mxu0  ;;  %v703_v59 = vpop.f32.mrf.mxu1 }
 0x109   : > { %v1016_v60 = vpack.c.bf16 %v822_v49, %v822_v49  ;;  %v820_v61 = vmax.f32 %v812_v50, 0.0  ;;  %v797_v62 = vmax.f32 %v1312_v12, %v773_v51  ;;  %v778_v63 = vadd.f32 %v1287_v52, %v739_v53 }
 0x10a   : > { %v815_v0 = vmax.f32 %v799_v54, %v807_v55  ;;  %v805_v1 = vmax.f32 %v1315_v13, %v789_v56  ;;  %v794_v2 = vadd.f32 %v1287_v52, %v755_v57  ;;  %v737_v3 = vmul.f32 %v1278_v43, %v639_v58  ;;  %v1062_v4 = vpop.f32.mrf.mxu0  ;;  %v1078_v5 = vpop.f32.mrf.mxu1 }
 0x10b   : > { %863 = vst.msk [vmem:[%s1361_s24 + $0x8] sm:$0xf] %vm860_vm1, %v1016_v60  ;;  %v1014_v6 = vpack.c.bf16 %v820_v61, %v820_v61  ;;  %v802_v7 = vmax.f32 %v1318_v14, %v778_v63  ;;  %v753_v8 = vmul.f32 %v1278_v43, %v703_v59  ;;  %v740_v9 = vmul.f32 %v1062_v4, %v1278_v43 }
 0x10c   : > { %v823_v10 = vmax.f32 %v815_v0, 0.0  ;;  %v813_v11 = vmax.f32 %v797_v62, %v805_v1  ;;  %v810_v12 = vmax.f32 %v1331_v22, %v794_v2  ;;  %v776_v13 = vadd.f32 %v1287_v52, %v737_v3  ;;  %v642_v15 = vpop.f32.mrf.mxu0  ;;  %v706_v19 = vpop.f32.mrf.mxu1 }
 0x10d   : > { %861 = vst.msk [vmem:[%s1361_s24] sm:$0xf] %vm860_vm1, %v1014_v6  ;;  %v792_v16 = vadd.f32 %v1287_v52, %v753_v8  ;;  %v779_v17 = vadd.f32 %v1287_v52, %v740_v9  ;;  %v756_v14 = vmul.f32 %v1078_v5, %v1278_v43  ;;  %v738_v18 = vmul.f32 %v1278_v43, %v642_v15 }
 0x10e   : > { %v1017_v20 = vpack.c.bf16 %v823_v10, %v823_v10  ;;  %v821_v21 = vmax.f32 %v813_v11, 0.0  ;;  %v818_v26 = vmax.f32 %v802_v7, %v810_v12  ;;  %v800_v22 = vmax.f32 %v1334_v23, %v776_v13 }
 0x10f   : > { %v808_v27 = vmax.f32 %v1337_v24, %v792_v16  ;;  %v803_v28 = vmax.f32 %v1340_v25, %v779_v17  ;;  %v795_v29 = vadd.f32 %v1287_v52, %v756_v14  ;;  %v777_v30 = vadd.f32 %v1287_v52, %v738_v18 }
 0x110   : > { %864 = vst.msk [vmem:[%s1361_s24 + $0xc] sm:$0xf] %vm860_vm1, %v1017_v20  ;;  %v1015_v34 = vpack.c.bf16 %v821_v21, %v821_v21  ;;  %v826_v35 = vmax.f32 %v818_v26, 0.0  ;;  %v754_v36 = vmul.f32 %v1278_v43, %v706_v19  ;;  %v785_v24 = vadd.f32 %v1287_v52, %v746_v42 }
 0x111   : > { %v816_v37 = vmax.f32 %v800_v22, %v808_v27  ;;  %v811_v23 = vmax.f32 %v1345_v32, %v795_v29  ;;  %v801_v38 = vmax.f32 %v769_v31, %v777_v30 }
 0x112   : > { %862 = vst.msk [vmem:[%s1361_s24 + $0x4] sm:$0xf] %vm860_vm1, %v1015_v34  ;;  %v1020_v25 = vpack.c.bf16 %v826_v35, %v826_v35  ;;  %v793_v33 = vadd.f32 %v1287_v52, %v754_v36 }
 0x113   : > { %v824_v39 = vmax.f32 %v816_v37, 0.0  ;;  %v819_v40 = vmax.f32 %v803_v28, %v811_v23 }
 0x114   : > { %867 = vst.msk [vmem:[%s1361_s24 + $0x18] sm:$0xf] %vm860_vm1, %v1020_v25  ;;  %v809_v41 = vmax.f32 %v785_v24, %v793_v33 }
 0x115   : > { %v1018_v44 = vpack.c.bf16 %v824_v39, %v824_v39  ;;  %v827_v43 = vmax.f32 %v819_v40, 0.0 }
 0x116   : > { %v817_v45 = vmax.f32 %v801_v38, %v809_v41 }
 0x117   : > { %865 = vst.msk [vmem:[%s1361_s24 + $0x10] sm:$0xf] %vm860_vm1, %v1018_v44  ;;  %v1021_v32 = vpack.c.bf16 %v827_v43, %v827_v43 }
 0x118   : > { %v825_v46 = vmax.f32 %v817_v45, 0.0 }
 0x119   : > { %868 = vst.msk [vmem:[%s1361_s24 + $0x1c] sm:$0xf] %vm860_vm1, %v1021_v32 }
 0x11a   : > { %v1019_v42 = vpack.c.bf16 %v825_v46, %v825_v46 }
 0x11c   : > { %866 = vst.msk [vmem:[%s1361_s24 + $0x14] sm:$0xf] %vm860_vm1, %v1019_v42 }
 0x11d PF: > { %p11_p9 = scmp.ge.s32.totalorder %s1194_s19, 4   ;;  %s1420_s15 = smov %s1146_s16 }
 0x11e   : > { %s1421_s16 = smov %s1203_s22  ;;  %s1422_s17 = smov %s1194_s19 }
 0x11f   :  { %13 = sbr.rel (!%p11_p9) target bundleno = 2 (0x2), region = 115 }

// kernel: artisanal_cnn_forward.4
= control target key start
LH: loop header
LB: loop body
LE: loop exit
PB: predicated region body
PF: predicated region fallthrough
CT: control target
= control target key end

     0   :  { %vm228_vm0 = vcmask 125952   ;;  %s396_s1 = inlined_call_operand.vmem [shape: bf16[128,16], index: 1, kind: input, shape index: {}]   ;;  %s397_s0 = inlined_call_operand.vmem [shape: bf16[4,16,128], index: 0, kind: input, shape index: {}]   ;;  %s398_s2 = inlined_call_operand.vmem [shape: f32[1,16], index: 2, kind: input, shape index: {}]   ;;  %s399_s3 = inlined_call_operand.vmem [shape: f32[1,16], index: 3, kind: input, shape index: {}]   ;;  %s400_s4 = inlined_call_operand.vmem [shape: bf16[16,16], index: 4, kind: output, shape index: {}]  }
   0x1   :  { %v311_v0 = vld [vmem:[%s396_s1 + $0x38] sm:$0xff]   ;;  %v312_v1 = vld [vmem:[%s396_s1 + $0x30] sm:$0xff]   ;;  %v313_v2 = vld [vmem:[%s396_s1 + $0x28] sm:$0xff]  }
   0x2   :  { %271 = vmatprep.subr.bf16.mxu0 %v311_v0  ;;  %295 = vmatprep.subr.bf16.mxu1 %v311_v0  ;;  %v314_v3 = vld [vmem:[%s396_s1 + $0x20] sm:$0xff]   ;;  %v320_v5 = vld [vmem:[%s397_s0 + $0x10] sm:$0xff]   ;;  %v315_v6 = vld [vmem:[%s396_s1 + $0x18] sm:$0xff]  }
   0x3   :  { %272 = vmatpush3.bf16.msra.mxu0 %v311_v0  ;;  %303 = vmatpush3.bf16.msra.mxu1 %v311_v0  ;;  %v319_v4 = vld [vmem:[%s397_s0] sm:$0xff]   ;;  %v316_v7 = vld [vmem:[%s396_s1 + $0x10] sm:$0xff]   ;;  %v317_v8 = vld [vmem:[%s396_s1 + $0x8] sm:$0xff]  }
   0x4   :  { %273 = vmatprep.subr.bf16.mxu0 %v312_v1  ;;  %296 = vmatprep.subr.bf16.mxu1 %v312_v1  ;;  %v318_v9 = vld [vmem:[%s396_s1] sm:$0xff]   ;;  %v321_v10 = vld [vmem:[%s397_s0 + $0x8] sm:$0xff]   ;;  %v322_v11 = vld [vmem:[%s397_s0 + $0x18] sm:$0xff]  }
   0x5   :  { %287 = vmatprep.mubr.bf16.mxu0 %v319_v4  ;;  %291 = vmatprep.mubr.bf16.mxu1 %v320_v5  ;;  %v253_v12 = vld [vmem:[%s398_s2] ss:$0 sm:$0xff] }
   0x6   :  { %v254_v17 = vld [vmem:[%s399_s3] ss:$0 sm:$0xff] }
   0x7   :  { %274 = vmatpush3.bf16.msra.mxu0 %v312_v1  ;;  %304 = vmatpush3.bf16.msra.mxu1 %v312_v1 }
   0x8   :  { %275 = vmatprep.subr.bf16.mxu0 %v313_v2  ;;  %297 = vmatprep.subr.bf16.mxu1 %v313_v2 }
   0xb   :  { %276 = vmatpush3.bf16.msra.mxu0 %v313_v2  ;;  %305 = vmatpush3.bf16.msra.mxu1 %v313_v2 }
   0xc   :  { %277 = vmatprep.subr.bf16.mxu0 %v314_v3  ;;  %298 = vmatprep.subr.bf16.mxu1 %v314_v3 }
   0xf   :  { %278 = vmatpush3.bf16.msra.mxu0 %v314_v3  ;;  %306 = vmatpush3.bf16.msra.mxu1 %v314_v3 }
  0x10   :  { %279 = vmatprep.subr.bf16.mxu0 %v315_v6  ;;  %299 = vmatprep.subr.bf16.mxu1 %v315_v6 }
  0x13   :  { %280 = vmatpush3.bf16.msra.mxu0 %v315_v6  ;;  %307 = vmatpush3.bf16.msra.mxu1 %v315_v6 }
  0x14   :  { %281 = vmatprep.subr.bf16.mxu0 %v316_v7  ;;  %300 = vmatprep.subr.bf16.mxu1 %v316_v7 }
  0x17   :  { %282 = vmatpush3.bf16.msra.mxu0 %v316_v7  ;;  %308 = vmatpush3.bf16.msra.mxu1 %v316_v7 }
  0x18   :  { %283 = vmatprep.subr.bf16.mxu0 %v317_v8  ;;  %301 = vmatprep.subr.bf16.mxu1 %v317_v8 }
  0x1b   :  { %284 = vmatpush3.bf16.msra.mxu0 %v317_v8  ;;  %309 = vmatpush3.bf16.msra.mxu1 %v317_v8 }
  0x1c   :  { %285 = vmatprep.subr.bf16.mxu0 %v318_v9  ;;  %302 = vmatprep.subr.bf16.mxu1 %v318_v9 }
  0x1f   :  { %286 = vmatpush3.bf16.msra.mxu0 %v318_v9  ;;  %310 = vmatpush3.bf16.msra.mxu1 %v318_v9 }
  0x22   :  { %288 = vmatmul.mubr.bf16.vlgmr.msra.gmra.mxu0 %v321_v10  ;;  %292 = vmatmul.mubr.bf16.vlgmr.msra.gmra.mxu1 %v322_v11 }
  0xe2   :  { %v289_v13 = vpop.f32.mrf.mxu0  ;;  %v293_v14 = vpop.f32.mrf.mxu1 }
  0xe3   :  { %v191_v15 = vmul.f32 %v289_v13, %v253_v12  ;;  %v195_v16 = vmul.f32 %v293_v14, %v253_v12 }
  0xe4   :  { %v151_v18 = vpop.f32.mrf.mxu0  ;;  %v167_v19 = vpop.f32.mrf.mxu1 }
  0xe5   :  { %v189_v20 = vmul.f32 %v253_v12, %v151_v18  ;;  %v193_v21 = vmul.f32 %v253_v12, %v167_v19  ;;  %v206_v24 = vadd.f32 %v254_v17, %v191_v15  ;;  %v210_v25 = vadd.f32 %v254_v17, %v195_v16 }
  0xe6   :  { %v290_v22 = vpop.f32.mrf.mxu0  ;;  %v294_v23 = vpop.f32.mrf.mxu1 }
  0xe7   :  { %v204_v26 = vadd.f32 %v254_v17, %v189_v20  ;;  %v208_v27 = vadd.f32 %v254_v17, %v193_v21  ;;  %v192_v28 = vmul.f32 %v290_v22, %v253_v12  ;;  %v196_v29 = vmul.f32 %v294_v23, %v253_v12 }
  0xe8   :  { %v154_v30 = vpop.f32.mrf.mxu0  ;;  %v170_v31 = vpop.f32.mrf.mxu1 }
  0xe9   :  { %v212_v32 = vmax.f32 %v204_v26, %v206_v24  ;;  %v214_v33 = vmax.f32 %v208_v27, %v210_v25  ;;  %v190_v34 = vmul.f32 %v253_v12, %v154_v30  ;;  %v194_v35 = vmul.f32 %v253_v12, %v170_v31 }
  0xea   :  { %v207_v37 = vadd.f32 %v254_v17, %v192_v28  ;;  %v211_v38 = vadd.f32 %v254_v17, %v196_v29 }
  0xeb   :  { %v216_v36 = vmax.f32 %v212_v32, %v214_v33  ;;  %v205_v39 = vadd.f32 %v254_v17, %v190_v34  ;;  %v209_v40 = vadd.f32 %v254_v17, %v194_v35 }
  0xed   :  { %v218_v41 = vmax.f32 %v216_v36, 0.0  ;;  %v213_v42 = vmax.f32 %v205_v39, %v207_v37  ;;  %v215_v43 = vmax.f32 %v209_v40, %v211_v38 }
  0xef   :  { %v257_v44 = vpack.c.bf16 %v218_v41, %v218_v41  ;;  %v217_v45 = vmax.f32 %v213_v42, %v215_v43 }
  0xf1   :  { %229 = vst.msk [vmem:[%s400_s4] sm:$0xf] %vm228_vm0, %v257_v44  ;;  %v219_v46 = vmax.f32 %v217_v45, 0.0 }
  0xf3   :  { %v258_v47 = vpack.c.bf16 %v219_v46, %v219_v46 }
  0xf5   :  { %230 = vst.msk [vmem:[%s400_s4 + $0x4] sm:$0xf] %vm228_vm0, %v258_v47 }

// kernel: artisanal_cnn_forward.5
= control target key start
LH: loop header
LB: loop body
LE: loop exit
PB: predicated region body
PF: predicated region fallthrough
CT: control target
= control target key end

     0   :  { %v1559_v30 = vmov 0   ;;  %vm370_vm0 = vcmask 261120   ;;  %vm1253_vm1 = vcmask 80896   ;;  %s1951_s1 = inlined_call_operand.vmem [shape: bf16[256,32], index: 1, kind: input, shape index: {}]   ;;  %s1952_s0 = inlined_call_operand.vmem [shape: bf16[16,256], index: 0, kind: input, shape index: {}]   ;;  %s1953_s4 = inlined_call_operand.vmem [shape: bf16[32,1024], index: 4, kind: input, shape index: {}]   ;;  %s1954_s6 = inlined_call_operand.vmem [shape: bf16[1024,10], index: 6, kind: input, shape index: {}]   ;;  %s1955_s2 = inlined_call_operand.vmem [shape: f32[1,32], index: 2, kind: input, shape index: {}]   ;;  %s1956_s3 = inlined_call_operand.vmem [shape: f32[1,32], index: 3, kind: input, shape index: {}]   ;;  %s1957_s5 = inlined_call_operand.vmem [shape: f32[1,1024], index: 5, kind: input, shape index: {}]   ;;  %s1958_s7 = inlined_call_operand.vmem [shape: f32[1,10], index: 7, kind: input, shape index: {}]   ;;  %s1959_s8 = inlined_call_operand.vmem [shape: f32[16,10], index: 8, kind: output, shape index: {}]  }
   0x1   :  { %v1476_v0 = vld [vmem:[%s1951_s1 + $0x78] sm:$0xff]   ;;  %v1478_v2 = vld [vmem:[%s1951_s1 + $0x70] sm:$0xff]   ;;  %v1480_v4 = vld [vmem:[%s1951_s1 + $0x68] sm:$0xff]   ;;  %406 = vmatprep.mubr.bf16.mxu1 %v1559_v30 }
   0x2   :  { %v1477_v1 = vld [vmem:[%s1951_s1 + $0x38] sm:$0xff]   ;;  %1365 = vmatprep.subr.bf16.mxu0 %v1476_v0  ;;  %v1479_v3 = vld [vmem:[%s1951_s1 + $0x30] sm:$0xff]   ;;  %v1481_v5 = vld [vmem:[%s1951_s1 + $0x28] sm:$0xff]  }
   0x3   :  { %1366 = vmatpush3.bf16.msra.mxu0 %v1477_v1  ;;  %v1482_v6 = vld [vmem:[%s1951_s1 + $0x60] sm:$0xff]   ;;  %v1484_v8 = vld [vmem:[%s1951_s1 + $0x58] sm:$0xff]   ;;  %v1486_v10 = vld [vmem:[%s1951_s1 + $0x50] sm:$0xff]  }
   0x4   :  { %1367 = vmatprep.subr.bf16.mxu0 %v1478_v2  ;;  %v1483_v7 = vld [vmem:[%s1951_s1 + $0x20] sm:$0xff]   ;;  %v1485_v9 = vld [vmem:[%s1951_s1 + $0x18] sm:$0xff]   ;;  %v1487_v12 = vld [vmem:[%s1951_s1 + $0x10] sm:$0xff]  }
   0x5   :  { %v1494_v11 = vld [vmem:[%s1952_s0 + $0x4] ss:$8 sps:$4 sm:$0xff]   ;;  %v1492_v17 = vld [vmem:[%s1952_s0] ss:$8 sps:$4 sm:$0xff]   ;;  %v1495_v31 = vld [vmem:[%s1954_s6 + $0x78] sm:$0xff]  }
   0x6   :  { %202 = vmatprep.mubr.bf16.mxu0 %v1494_v11  ;;  %v1488_v13 = vld [vmem:[%s1951_s1 + $0x48] sm:$0xff]   ;;  %v1490_v15 = vld [vmem:[%s1951_s1 + $0x40] sm:$0xff]   ;;  %v1496_v32 = vld [vmem:[%s1954_s6 + $0x38] sm:$0xff]  }
   0x7   :  { %1368 = vmatpush3.bf16.msra.mxu0 %v1479_v3  ;;  %v1489_v14 = vld [vmem:[%s1951_s1 + $0x8] sm:$0xff]   ;;  %v1491_v16 = vld [vmem:[%s1951_s1] sm:$0xff]   ;;  %v1497_v33 = vld [vmem:[%s1954_s6 + $0x70] sm:$0xff]  }
   0x8   :  { %1369 = vmatprep.subr.bf16.mxu0 %v1480_v4  ;;  %v240_v18 = vld [vmem:[%s1953_s4 + $0x40] sm:$0xff]  ;;  %v241_v26 = vld [vmem:[%s1953_s4 + $0x48] sm:$0xff]  ;;  %v1498_v34 = vld [vmem:[%s1954_s6 + $0x30] sm:$0xff]  }
   0x9   :  { %v244_v19 = vld [vmem:[%s1953_s4 + $0x60] sm:$0xff]  ;;  %v245_v27 = vld [vmem:[%s1953_s4 + $0x68] sm:$0xff]  ;;  %v1507_v39 = vld [vmem:[%s1954_s6 + $0x58] sm:$0xff]  }
   0xa   :  { %v1289_v20 = vcombine.high %v240_v18, %v244_v19  ;;  %v1288_v21 = vcombine.low %v240_v18, %v244_v19  ;;  %v232_v22 = vld [vmem:[%s1953_s4] sm:$0xff]  ;;  %v1290_v28 = vcombine.low %v241_v26, %v245_v27  ;;  %v1291_v29 = vcombine.high %v241_v26, %v245_v27  ;;  %v1499_v35 = vld [vmem:[%s1954_s6 + $0x68] sm:$0xff]   ;;  %v1509_v40 = vld [vmem:[%s1954_s6 + $0x18] sm:$0xff]  }
   0xb   :  { %1370 = vmatpush3.bf16.msra.mxu0 %v1481_v5  ;;  %v236_v23 = vld [vmem:[%s1953_s4 + $0x20] sm:$0xff]  ;;  %v1501_v36 = vld [vmem:[%s1954_s6 + $0x28] sm:$0xff]   ;;  %v242_v59 = vld [vmem:[%s1953_s4 + $0x50] sm:$0xff] }
   0xc   :  { %1371 = vmatprep.subr.bf16.mxu0 %v1482_v6  ;;  %386 = vmatprep.subr.bf16.mxu1 %v1289_v20  ;;  %v1281_v24 = vcombine.high %v232_v22, %v236_v23  ;;  %v1280_v25 = vcombine.low %v232_v22, %v236_v23  ;;  %v1503_v37 = vld [vmem:[%s1954_s6 + $0x60] sm:$0xff]   ;;  %v233_v53 = vld [vmem:[%s1953_s4 + $0x8] sm:$0xff]  ;;  %v246_v60 = vld [vmem:[%s1953_s4 + $0x70] sm:$0xff] }
   0xd   :  { %387 = vmatpush1.bf16.msra.mxu1 %v1288_v21  ;;  %v1505_v38 = vld [vmem:[%s1954_s6 + $0x20] sm:$0xff]   ;;  %v237_v54 = vld [vmem:[%s1953_s4 + $0x28] sm:$0xff]  ;;  %v1293_v62 = vcombine.high %v242_v59, %v246_v60  ;;  %v234_v63 = vld [vmem:[%s1953_s4 + $0x10] sm:$0xff]  ;;  %v1292_v1 = vcombine.low %v242_v59, %v246_v60 }
   0xe   :  { %388 = vmatprep.subr.bf16.mxu1 %v1281_v24  ;;  %v1278_v43 = vld [vmem:[%s1955_s2] ss:$0 sm:$0xff]  ;;  %v1283_v58 = vcombine.high %v233_v53, %v237_v54  ;;  %v1282_v61 = vcombine.low %v233_v53, %v237_v54  ;;  %v238_v0 = vld [vmem:[%s1953_s4 + $0x30] sm:$0xff]  ;;  %v243_v3 = vld [vmem:[%s1953_s4 + $0x58] sm:$0xff] }
   0xf   :  { %1372 = vmatpush3.bf16.msra.mxu0 %v1483_v7  ;;  %v1279_v47 = vld [vmem:[%s1956_s3] ss:$0 sm:$0xff]  ;;  %v1285_v2 = vcombine.high %v234_v63, %v238_v0  ;;  %v247_v4 = vld [vmem:[%s1953_s4 + $0x78] sm:$0xff]  ;;  %v1284_v5 = vcombine.low %v234_v63, %v238_v0  ;;  %v1511_v18 = vld [vmem:[%s1954_s6 + $0x50] sm:$0xff]  }
  0x10   :  { %1373 = vmatprep.subr.bf16.mxu0 %v1484_v8  ;;  %v1295_v6 = vcombine.high %v243_v3, %v247_v4  ;;  %v235_v7 = vld [vmem:[%s1953_s4 + $0x18] sm:$0xff]  ;;  %v1512_v19 = vld [vmem:[%s1954_s6 + $0xe0] sm:$0xff]   ;;  %v1513_v20 = vld [vmem:[%s1954_s6 + $0x10] sm:$0xff]  }
  0x11   :  { %389 = vmatpush1.bf16.msra.mxu1 %v1280_v25  ;;  %v239_v8 = vld [vmem:[%s1953_s4 + $0x38] sm:$0xff]  ;;  %v1514_v21 = vld [vmem:[%s1954_s6 + $0xa0] sm:$0xff]   ;;  %v1515_v22 = vld [vmem:[%s1954_s6 + $0x48] sm:$0xff]  }
  0x12   :  { %429 = vmatprep.subr.bf16.mxu1 %v1291_v29  ;;  %v1286_v11 = vcombine.low %v235_v7, %v239_v8  ;;  %v1516_v23 = vld [vmem:[%s1954_s6 + $0xd8] sm:$0xff]   ;;  %v1517_v24 = vld [vmem:[%s1954_s6 + $0x8] sm:$0xff]   ;;  %v1519_v26 = vld [vmem:[%s1954_s6 + $0x40] sm:$0xff]  }
  0x13   :  { %1374 = vmatpush3.bf16.msra.mxu0 %v1485_v9  ;;  %v1294_v9 = vcombine.low %v243_v3, %v247_v4  ;;  %v1518_v25 = vld [vmem:[%s1954_s6 + $0x98] sm:$0xff]   ;;  %v1520_v27 = vld [vmem:[%s1954_s6 + $0xd0] sm:$0xff]  }
  0x14   :  { %1375 = vmatprep.subr.bf16.mxu0 %v1486_v10  ;;  %v1287_v10 = vcombine.high %v235_v7, %v239_v8  ;;  %v1522_v29 = vld [vmem:[%s1954_s6 + $0x90] sm:$0xff]  }
  0x15   :  { %v1530_v8 = vld [vmem:[%s1954_s6 + $0x130] sm:$0xff]  }
  0x17   :  { %1376 = vmatpush3.bf16.msra.mxu0 %v1487_v12  ;;  %v1500_v12 = vld [vmem:[%s1954_s6 + $0xf8] sm:$0xff]  }
  0x18   :  { %1377 = vmatprep.subr.bf16.mxu0 %v1488_v13  ;;  %v1502_v13 = vld [vmem:[%s1954_s6 + $0xb8] sm:$0xff]  }
  0x1b   :  { %1378 = vmatpush3.bf16.msra.mxu0 %v1489_v14  ;;  %v1504_v14 = vld [vmem:[%s1954_s6 + $0xf0] sm:$0xff]  }
  0x1c   :  { %1379 = vmatprep.subr.bf16.mxu0 %v1490_v15  ;;  %v1506_v15 = vld [vmem:[%s1954_s6 + $0xb0] sm:$0xff]  }
  0x1f   :  { %1380 = vmatpush3.bf16.msra.mxu0 %v1491_v16  ;;  %v1508_v16 = vld [vmem:[%s1954_s6 + $0xe8] sm:$0xff]  }
  0x20   :  { %1387 = vmatprep.subr.bf16.mxu0 %v1495_v31  ;;  %v1524_v31 = vld [vmem:[%s1954_s6 + $0x178] sm:$0xff]  }
  0x22   :  { %203 = vmatmul.mubr.bf16.vlgmr.msra.gmra.mxu0 %v1492_v17  ;;  %v1510_v17 = vld [vmem:[%s1954_s6 + $0xa8] sm:$0xff]  }
  0x23   :  { %1388 = vmatpush3.bf16.msra.mxu0 %v1496_v32  ;;  %v1525_v32 = vld [vmem:[%s1954_s6 + $0x88] sm:$0xff]  }
  0x24   :  { %1389 = vmatprep.subr.bf16.mxu0 %v1497_v33  ;;  %v1527_v33 = vld [vmem:[%s1954_s6 + $0xc0] sm:$0xff]  }
  0x27   :  { %1390 = vmatpush3.bf16.msra.mxu0 %v1498_v34  ;;  %v1529_v34 = vld [vmem:[%s1954_s6 + $0x80] sm:$0xff]  }
  0x28   :  { %1391 = vmatprep.subr.bf16.mxu0 %v1499_v35  ;;  %v1532_v35 = vld [vmem:[%s1954_s6 + $0x1f8] sm:$0xff]  }
  0x2b   :  { %1392 = vmatpush3.bf16.msra.mxu0 %v1501_v36  ;;  %v250_v36 = vlaneseq }
  0x2c   :  { %1393 = vmatprep.subr.bf16.mxu0 %v1503_v37 }
  0x2d   :  { %v1823_v37 = vshrl.u32 %v250_v36, 7 }
  0x2f   :  { %1394 = vmatpush3.bf16.msra.mxu0 %v1505_v38  ;;  %v256_v38 = vsub.s32 1, %v1823_v37  ;;  %v272_v4 = vsub.s32 5, %v1823_v37 }
  0x30   :  { %1395 = vmatprep.subr.bf16.mxu0 %v1507_v39  ;;  %v252_v39 = vsub.s32 0, %v1823_v37 }
  0x33   :  { %1396 = vmatpush3.bf16.msra.mxu0 %v1509_v40  ;;  %v1830_v40 = vld [vmem:[%s1957_s5] sm:$0xff] }
  0x34   :  { %1397 = vmatprep.subr.bf16.mxu0 %v1511_v18  ;;  %v1533_v18 = vld [vmem:[%s1954_s6 + $0x128] sm:$0xff]  }
  0x37   :  { %1398 = vmatpush3.bf16.msra.mxu0 %v1513_v20 }
  0x38   :  { %1399 = vmatprep.subr.bf16.mxu0 %v1515_v22  ;;  %v1535_v22 = vld [vmem:[%s1954_s6 + $0x160] sm:$0xff]  }
  0x3b   :  { %1400 = vmatpush3.bf16.msra.mxu0 %v1517_v24 }
  0x3c   :  { %1401 = vmatprep.subr.bf16.mxu0 %v1519_v26 }
  0xe2   :  { %v1381_v41 = vpop.f32.mrf.mxu0 }
  0xe4   :  { %v1382_v42 = vpop.f32.mrf.mxu0 }
  0xe5   :  { %v1383_v44 = vadd.f32 %v1382_v42, %v1381_v41  ;;  %v257_v42 = vrot.slane %v1830_v40, %v256_v38 }
  0xe6   :  { %v1384_v45 = vpop.f32.mrf.mxu0 }
  0xe7   :  { %v218_v46 = vmul.f32 %v1383_v44, %v1278_v43 }
  0xe8   :  { %v1385_v48 = vpop.f32.mrf.mxu0 }
  0xe9   :  { %v1386_v49 = vadd.f32 %v1385_v48, %v1384_v45  ;;  %v227_v50 = vadd.f32 %v1279_v47, %v218_v46  ;;  %v264_v48 = vsub.s32 3, %v1823_v37 }
  0xeb   :  { %v219_v51 = vmul.f32 %v1386_v49, %v1278_v43  ;;  %v229_v55 = vmax.f32 %v227_v50, 0.0  ;;  %v253_v43 = vrot.slane %v1830_v40, %v252_v39  ;;  %v1541_v39 = vld [vmem:[%s1954_s6 + $0x118] sm:$0xff]  }
  0xed   :  { %v228_v52 = vadd.f32 %v1279_v47, %v219_v51  ;;  %v260_v51 = vsub.s32 2, %v1823_v37 }
  0xef   :  { %v230_v56 = vmax.f32 %v228_v52, 0.0  ;;  %v261_v59 = vrot.slane %v1830_v40, %v260_v51  ;;  %v1547_v51 = vld [vmem:[%s1954_s6 + $0x148] sm:$0xff]  }
  0xf1   :  { %v231_v57 = vpack.c.bf16 %v230_v56, %v229_v55 }
  0xf3   :  { %1296 = vmatmul.mubr.msk.bf16.vlgmr.msra.gmra.mxu1 %vm370_vm0, %v231_v57 }
  0xf4   :  { %430 = vmatpush1.bf16.msra.mxu1 %v1290_v28  ;;  %449 = vmatprep.mubr.bf16.mxu1 %v1559_v30  ;;  %v1521_v28 = vld [vmem:[%s1954_s6] sm:$0xff]  }
  0xf5   :  { %431 = vmatprep.subr.bf16.mxu1 %v1283_v58  ;;  %1402 = vmatpush3.bf16.msra.mxu0 %v1521_v28  ;;  %v1537_v28 = vld [vmem:[%s1954_s6 + $0x120] sm:$0xff]  }
  0xf6   :  { %1431 = vmatprep.subr.bf16.mxu0 %v1524_v31  ;;  %v1539_v31 = vld [vmem:[%s1954_s6 + $0x158] sm:$0xff]  }
  0xf8   :  { %432 = vmatpush1.bf16.msra.mxu1 %v1282_v61 }
  0xf9   :  { %472 = vmatprep.subr.bf16.mxu1 %v1293_v62  ;;  %v1526_v62 = vld [vmem:[%s1954_s6 + $0x138] sm:$0xff]  }
  0xfb   :  { %1297 = vmatmul.mubr.msk.bf16.vlgmr.msra.gmra.mxu1 %vm370_vm0, %v231_v57 }
  0xfc   :  { %473 = vmatpush1.bf16.msra.mxu1 %v1292_v1  ;;  %492 = vmatprep.mubr.bf16.mxu1 %v1559_v30  ;;  %v1528_v1 = vld [vmem:[%s1954_s6 + $0x170] sm:$0xff]  }
  0xfd   :  { %474 = vmatprep.subr.bf16.mxu1 %v1285_v2 }
 0x100   :  { %475 = vmatpush1.bf16.msra.mxu1 %v1284_v5 }
 0x101   :  { %515 = vmatprep.subr.bf16.mxu1 %v1295_v6 }
 0x103   :  { %1298 = vmatmul.mubr.msk.bf16.vlgmr.msra.gmra.mxu1 %vm370_vm0, %v231_v57 }
 0x104   :  { %516 = vmatpush1.bf16.msra.mxu1 %v1294_v9  ;;  %535 = vmatprep.mubr.bf16.mxu1 %v1559_v30  ;;  %v1523_v30 = vld [vmem:[%s1954_s6 + $0xc8] sm:$0xff]  }
 0x105   :  { %517 = vmatprep.subr.bf16.mxu1 %v1287_v10 }
 0x108   :  { %518 = vmatpush1.bf16.msra.mxu1 %v1286_v11  ;;  %v1531_v11 = vld [vmem:[%s1954_s6 + $0x168] sm:$0xff]  }
 0x109   :  { %1409 = vmatprep.subr.bf16.mxu1 %v1500_v12 }
 0x10b   :  { %1299 = vmatmul.mubr.msk.bf16.vlgmr.msra.gmra.mxu1 %vm370_vm0, %v231_v57  ;;  %v265_v57 = vrot.slane %v1830_v40, %v264_v48 }
 0x10c   :  { %1410 = vmatpush3.bf16.msra.mxu1 %v1502_v13 }
 0x10d   :  { %1411 = vmatprep.subr.bf16.mxu1 %v1504_v14  ;;  %v273_v14 = vrot.slane %v1830_v40, %v272_v4 }
 0x110   :  { %1412 = vmatpush3.bf16.msra.mxu1 %v1506_v15 }
 0x111   :  { %1413 = vmatprep.subr.bf16.mxu1 %v1508_v16 }
 0x114   :  { %1414 = vmatpush3.bf16.msra.mxu1 %v1510_v17 }
 0x115   :  { %1415 = vmatprep.subr.bf16.mxu1 %v1512_v19  ;;  %v1534_v19 = vld [vmem:[%s1954_s6 + $0x1b8] sm:$0xff]  }
 0x118   :  { %1416 = vmatpush3.bf16.msra.mxu1 %v1514_v21 }
 0x119   :  { %1417 = vmatprep.subr.bf16.mxu1 %v1516_v23  ;;  %v1536_v23 = vld [vmem:[%s1954_s6 + $0x1f0] sm:$0xff]  }
 0x11c   :  { %1418 = vmatpush3.bf16.msra.mxu1 %v1518_v25  ;;  %v280_v25 = vsub.s32 7, %v1823_v37 }
 0x11d   :  { %1419 = vmatprep.subr.bf16.mxu1 %v1520_v27 }
 0x120   :  { %1420 = vmatpush3.bf16.msra.mxu1 %v1522_v29  ;;  %v1538_v29 = vld [vmem:[%s1954_s6 + $0x1b0] sm:$0xff]  }
 0x121   :  { %1421 = vmatprep.subr.bf16.mxu1 %v1523_v30 }
 0x124   :  { %1422 = vmatpush3.bf16.msra.mxu1 %v1525_v32  ;;  %v1540_v32 = vld [vmem:[%s1954_s6 + $0x1e8] sm:$0xff]  }
 0x125   :  { %1423 = vmatprep.subr.bf16.mxu1 %v1527_v33 }
 0x128   :  { %1424 = vmatpush3.bf16.msra.mxu1 %v1529_v34 }
 0x129   :  { %1453 = vmatprep.subr.bf16.mxu1 %v1532_v35  ;;  %v281_v35 = vrot.slane %v1830_v40, %v280_v25 }
 0x1b3   :  { %v408_v41 = vpop.f32.mrf.mxu1 }
 0x1b4   :  { %v409_v49 = vadd.f32 %v408_v41, %v253_v43  ;;  %v1542_v41 = vld [vmem:[%s1954_s6 + $0x1a8] sm:$0xff]  }
 0x1b5   :  { %v410_v44 = vpop.f32.mrf.mxu1 }
 0x1b6   :  { %v411_v46 = vadd.f32 %v410_v44, %v257_v42  ;;  %v546_v58 = vmax.f32 %v409_v49, 0.0  ;;  %v1544_v44 = vld [vmem:[%s1954_s6 + $0x1e0] sm:$0xff]   ;;  %v1545_v49 = vld [vmem:[%s1954_s6 + $0x110] sm:$0xff]  }
 0x1b7   :  { %v412_v45 = vpop.f32.mrf.mxu1 }
 0x1b8   :  { %v413_v47 = vadd.f32 %v412_v45, %v253_v43  ;;  %v547_v55 = vmax.f32 %v411_v46, 0.0  ;;  %v1543_v43 = vld [vmem:[%s1954_s6 + $0x150] sm:$0xff]   ;;  %v268_v46 = vsub.s32 4, %v1823_v37 }
 0x1b9   :  { %v414_v50 = vpop.f32.mrf.mxu1 }
 0x1ba   :  { %v415_v52 = vadd.f32 %v414_v50, %v257_v42  ;;  %v554_v53 = vmax.f32 %v413_v47, 0.0  ;;  %v1546_v50 = vld [vmem:[%s1954_s6 + $0x1a0] sm:$0xff]  }
 0x1bb   :  { %v451_v54 = vpop.f32.mrf.mxu1 }
 0x1bc   :  { %v555_v56 = vmax.f32 %v415_v52, 0.0  ;;  %v562_v63 = vpack.c.bf16 %v554_v53, %v546_v58  ;;  %v452_v5 = vadd.f32 %v451_v54, %v261_v59  ;;  %v1548_v52 = vld [vmem:[%s1954_s6 + $0x1d8] sm:$0xff]  }
 0x1bd   :  { %v453_v60 = vpop.f32.mrf.mxu1  ;;  %v1550_v58 = vld [vmem:[%s1954_s6 + $0x198] sm:$0xff]  }
 0x1be   :  { %v563_v61 = vpack.c.bf16 %v555_v56, %v547_v55  ;;  %v454_v2 = vadd.f32 %v453_v60, %v265_v57  ;;  %v548_v15 = vmax.f32 %v452_v5, 0.0  ;;  %v269_v55 = vrot.slane %v1830_v40, %v268_v46  ;;  %v1551_v60 = vld [vmem:[%s1954_s6 + $0x140] sm:$0xff]   ;;  %v1556_v5 = vld [vmem:[%s1954_s6 + $0x188] sm:$0xff]  }
 0x1bf   :  { %v455_v0 = vpop.f32.mrf.mxu1 }
 0x1c0   :  { %v456_v3 = vadd.f32 %v455_v0, %v261_v59  ;;  %1121 = vmatprep.mubr.bf16.mxu0 %v563_v61  ;;  %v549_v12 = vmax.f32 %v454_v2, 0.0  ;;  %v1552_v61 = vld [vmem:[%s1954_s6 + $0x1d0] sm:$0xff]   ;;  %v1553_v0 = vld [vmem:[%s1954_s6 + $0x100] sm:$0xff]  }
 0x1c1   :  { %v457_v6 = vpop.f32.mrf.mxu1  ;;  %1122 = vmatmul.mubr.bf16.vlgmr.msra.gmra.mxu0 %v562_v63  ;;  %v276_v63 = vsub.s32 6, %v1823_v37 }
 0x1c2   :  { %v458_v7 = vadd.f32 %v457_v6, %v265_v57  ;;  %1432 = vmatpush3.bf16.msra.mxu0 %v1526_v62  ;;  %v556_v9 = vmax.f32 %v456_v3, 0.0  ;;  %v1549_v57 = vld [vmem:[%s1954_s6 + $0x108] sm:$0xff]  }
 0x1c3   :  { %v1848_v10 = vpop.f32.mrf.mxu1  ;;  %1433 = vmatprep.subr.bf16.mxu0 %v1528_v1  ;;  %v1554_v1 = vld [vmem:[%s1954_s6 + $0x190] sm:$0xff]   ;;  %v1555_v3 = vld [vmem:[%s1954_s6 + $0x1c8] sm:$0xff]   ;;  %v277_v37 = vrot.slane %v1830_v40, %v276_v63  ;;  %v1558_v40 = vld [vmem:[%s1954_s6 + $0x180] sm:$0xff]  }
 0x1c4   :  { %v557_v13 = vmax.f32 %v458_v7, 0.0  ;;  %v564_v20 = vpack.c.bf16 %v556_v9, %v548_v15  ;;  %v495_v62 = vadd.f32 %v1848_v10, %v269_v55 }
 0x1c5   :  { %v496_v16 = vpop.f32.mrf.mxu1 }
 0x1c6   :  { %v565_v17 = vpack.c.bf16 %v557_v13, %v549_v12  ;;  %1434 = vmatpush3.bf16.msra.mxu0 %v1530_v8  ;;  %v497_v24 = vadd.f32 %v496_v16, %v273_v14  ;;  %v550_v4 = vmax.f32 %v495_v62, 0.0  ;;  %v1557_v8 = vld [vmem:[%s1954_s6 + $0x1c0] sm:$0xff]  }
 0x1c7   :  { %v498_v21 = vpop.f32.mrf.mxu1  ;;  %1435 = vmatprep.subr.bf16.mxu0 %v1531_v11 }
 0x1c8   :  { %1162 = vmatprep.mubr.bf16.mxu1 %v565_v17  ;;  %v551_v33 = vmax.f32 %v497_v24, 0.0  ;;  %v499_v59 = vadd.f32 %v498_v21, %v269_v55 }
 0x1c9   :  { %v500_v26 = vpop.f32.mrf.mxu1  ;;  %1163 = vmatmul.mubr.bf16.vlgmr.msra.gmra.mxu1 %v564_v20 }
 0x1ca   :  { %v501_v27 = vadd.f32 %v500_v26, %v273_v14  ;;  %1436 = vmatpush3.bf16.msra.mxu0 %v1533_v18  ;;  %1454 = vmatpush3.bf16.msra.mxu1 %v1534_v19  ;;  %v558_v2 = vmax.f32 %v499_v59, 0.0 }
 0x1cb   :  { %v1873_v30 = vpop.f32.mrf.mxu1  ;;  %1437 = vmatprep.subr.bf16.mxu0 %v1535_v22  ;;  %1455 = vmatprep.subr.bf16.mxu1 %v1536_v23  ;;  %v1300_v23 = vld [vmem:[%s1958_s7] ss:$0 sm:$0xff] }
 0x1cc   :  { %v559_v34 = vmax.f32 %v501_v27, 0.0  ;;  %v566_v6 = vpack.c.bf16 %v558_v2, %v550_v4  ;;  %v538_v9 = vadd.f32 %v1873_v30, %v277_v37 }
 0x1cd   :  { %v539_v36 = vpop.f32.mrf.mxu1 }
 0x1ce   :  { %v567_v38 = vpack.c.bf16 %v559_v34, %v551_v33  ;;  %1438 = vmatpush3.bf16.msra.mxu0 %v1537_v28  ;;  %1456 = vmatpush3.bf16.msra.mxu1 %v1538_v29  ;;  %v540_v45 = vadd.f32 %v539_v36, %v281_v35  ;;  %v552_v11 = vmax.f32 %v538_v9, 0.0 }
 0x1cf   :  { %v541_v42 = vpop.f32.mrf.mxu1  ;;  %1439 = vmatprep.subr.bf16.mxu0 %v1539_v31  ;;  %1457 = vmatprep.subr.bf16.mxu1 %v1540_v32 }
 0x1d0   :  { %1203 = vmatprep.mubr.bf16.mxu0 %v567_v38  ;;  %v553_v53 = vmax.f32 %v540_v45, 0.0  ;;  %v542_v7 = vadd.f32 %v541_v42, %v277_v37 }
 0x1d1   :  { %v543_v47 = vpop.f32.mrf.mxu1 }
 0x1d2   :  { %v544_v48 = vadd.f32 %v543_v47, %v281_v35  ;;  %1440 = vmatpush3.bf16.msra.mxu0 %v1541_v39  ;;  %1458 = vmatpush3.bf16.msra.mxu1 %v1542_v41  ;;  %v560_v10 = vmax.f32 %v542_v7, 0.0 }
 0x1d3   :  { %1441 = vmatprep.subr.bf16.mxu0 %v1543_v43  ;;  %1459 = vmatprep.subr.bf16.mxu1 %v1544_v44 }
 0x1d4   :  { %v561_v54 = vmax.f32 %v544_v48, 0.0  ;;  %v568_v12 = vpack.c.bf16 %v560_v10, %v552_v11 }
 0x1d6   :  { %v569_v56 = vpack.c.bf16 %v561_v54, %v553_v53  ;;  %1442 = vmatpush3.bf16.msra.mxu0 %v1545_v49  ;;  %1460 = vmatpush3.bf16.msra.mxu1 %v1546_v50 }
 0x1d7   :  { %1443 = vmatprep.subr.bf16.mxu0 %v1547_v51  ;;  %1461 = vmatprep.subr.bf16.mxu1 %v1548_v52 }
 0x1d8   :  { %1244 = vmatprep.mubr.bf16.mxu1 %v569_v56 }
 0x1da   :  { %1444 = vmatpush3.bf16.msra.mxu0 %v1549_v57  ;;  %1462 = vmatpush3.bf16.msra.mxu1 %v1550_v58 }
 0x1db   :  { %1445 = vmatprep.subr.bf16.mxu0 %v1551_v60  ;;  %1463 = vmatprep.subr.bf16.mxu1 %v1552_v61 }
 0x1de   :  { %1446 = vmatpush3.bf16.msra.mxu0 %v1553_v0  ;;  %1464 = vmatpush3.bf16.msra.mxu1 %v1554_v1 }
 0x1df   :  { %1465 = vmatprep.subr.bf16.mxu1 %v1555_v3 }
 0x1e1   :  { %1204 = vmatmul.mubr.bf16.vlgmr.msra.gmra.mxu0 %v566_v6 }
 0x1e2   :  { %1466 = vmatpush3.bf16.msra.mxu1 %v1556_v5 }
 0x1e3   :  { %1467 = vmatprep.subr.bf16.mxu1 %v1557_v8 }
 0x1e6   :  { %1468 = vmatpush3.bf16.msra.mxu1 %v1558_v40 }
 0x1e9   :  { %1245 = vmatmul.mubr.bf16.vlgmr.msra.gmra.mxu1 %v568_v12 }
 0x281   :  { %v1403_v13 = vpop.f32.mrf.mxu0 }
 0x283   :  { %v1404_v14 = vpop.f32.mrf.mxu0 }
 0x284   :  { %v1405_v22 = vadd.f32 %v1404_v14, %v1403_v13 }
 0x285   :  { %v1406_v15 = vpop.f32.mrf.mxu0 }
 0x286   :  { %v1124_v27 = vadd.f32 %v1405_v22, %v1300_v23 }
 0x287   :  { %v1407_v17 = vpop.f32.mrf.mxu0 }
 0x288   :  { %v1408_v28 = vadd.f32 %v1407_v17, %v1406_v15 }
 0x289   :  { %v1425_v16 = vpop.f32.mrf.mxu1 }
 0x28a   :  { %v1127_v35 = vadd.f32 %v1408_v28, %v1300_v23 }
 0x28b   :  { %v1426_v18 = vpop.f32.mrf.mxu1 }
 0x28c   :  { %v1427_v25 = vadd.f32 %v1426_v18, %v1425_v16 }
 0x28d   :  { %v1428_v20 = vpop.f32.mrf.mxu1 }
 0x28e   :  { %v1165_v32 = vadd.f32 %v1427_v25, %v1124_v27 }
 0x28f   :  { %v1429_v26 = vpop.f32.mrf.mxu1 }
 0x290   :  { %v1430_v33 = vadd.f32 %v1429_v26, %v1428_v20 }
 0x292   :  { %v1168_v42 = vadd.f32 %v1430_v33, %v1127_v35 }
 0x2a1   :  { %v1447_v19 = vpop.f32.mrf.mxu0 }
 0x2a3   :  { %v1448_v21 = vpop.f32.mrf.mxu0 }
 0x2a4   :  { %v1449_v29 = vadd.f32 %v1448_v21, %v1447_v19 }
 0x2a5   :  { %v1450_v24 = vpop.f32.mrf.mxu0 }
 0x2a6   :  { %v1206_v36 = vadd.f32 %v1449_v29, %v1165_v32 }
 0x2a7   :  { %v1451_v30 = vpop.f32.mrf.mxu0 }
 0x2a8   :  { %v1452_v38 = vadd.f32 %v1451_v30, %v1450_v24 }
 0x2a9   :  { %v1469_v31 = vpop.f32.mrf.mxu1 }
 0x2aa   :  { %v1209_v45 = vadd.f32 %v1452_v38, %v1168_v42 }
 0x2ab   :  { %v1470_v34 = vpop.f32.mrf.mxu1 }
 0x2ac   :  { %v1471_v39 = vadd.f32 %v1470_v34, %v1469_v31 }
 0x2ad   :  { %v1472_v41 = vpop.f32.mrf.mxu1 }
 0x2ae   :  { %v1247_v43 = vadd.f32 %v1471_v39, %v1206_v36 }
 0x2af   :  { %v1473_v44 = vpop.f32.mrf.mxu1 }
 0x2b0   :  { %1254 = vst.msk [vmem:[%s1959_s8] sm:$0xff] %vm1253_vm1, %v1247_v43  ;;  %v1474_v46 = vadd.f32 %v1473_v44, %v1472_v41 }
 0x2b2   :  { %v1250_v47 = vadd.f32 %v1474_v46, %v1209_v45 }
 0x2b4   :  { %1255 = vst.msk [vmem:[%s1959_s8 + $0x8] sm:$0xff] %vm1253_vm1, %v1250_v47 }

</bundles_post_ra>
